<compile_context>
chip_gen: v7x
topology: tpu7x:2x2x1
jax: 0.10.0
libtpu: 0.0.40
codegen_flags: <defaults>
</compile_context>

<pallas_src>
import jax
import jax.numpy as jnp
from jax.experimental import pallas as pl
from jax.experimental.pallas import tpu as pltpu

NEG_SLOPE = 0.01          # PyTorch leaky_relu default
K = 5                     # conv1 / conv_t kernel == stride
C_PAD = 128               # 127 channels zero-padded to one full lane width
PK = 32                   # 25 patch taps padded to 32 -> 64-byte bf16 rows
OUT_W = C_PAD * K * K     # 3200-wide conv_t output per patch row


def _fused_kernel(patches_ref, w1_ref, w2_ref, b2_ref, wt_ref, bt_ref,
                  out_ref, f1_ref):
    # Grid: i = row tile of patches (parallel), j = tn-wide output column slice
    # (arbitrary).  conv1/conv2 are computed once per row tile and cached.
    @pl.when(pl.program_id(1) == 0)
    def _():
        # conv1 as patch matmul (bf16 MXU operands, f32 accumulate), leaky_relu.
        m1 = jnp.dot(patches_ref[...], w1_ref[...],
                     preferred_element_type=jnp.float32)
        m1 = jnp.where(m1 > 0, m1, NEG_SLOPE * m1)
        # conv2 (1x1 conv == 128x128 matmul) + bias, relu.  Cached in VMEM.
        f1 = jnp.dot(m1.astype(jnp.bfloat16), w2_ref[...],
                     preferred_element_type=jnp.float32) + b2_ref[...]
        f1_ref[...] = jnp.maximum(f1, 0.0).astype(f1_ref.dtype)

    # conv_transpose (stride == kernel -> disjoint 5x5 output blocks) for the
    # j-th (128, tn) column slice of the (C_in, C_out*25) weight + bias, relu.
    f2 = jnp.dot(f1_ref[...], wt_ref[...],
                 preferred_element_type=jnp.float32) + bt_ref[...]
    out_ref[...] = jnp.maximum(f2, 0.0).astype(out_ref.dtype)   # bf16 store


def fused_forward_pallas(patches, w1m, w2m, b2m, wtm, btm, *, tm, tn=640):
    """patches: (P, 32) bf16, P a multiple of tm.  Weights padded to 128 ch.

    Output is bf16 (P, 3200) with columns ordered (c_pad, kh, kw).
    """
    P, pk = patches.shape
    out_dim = wtm.shape[1]
    assert P % tm == 0
    assert out_dim % tn == 0 and tn % 128 == 0, "tn must be a 128-multiple divisor of 3200"
    nj = out_dim // tn

    return pl.pallas_call(
        _fused_kernel,
        out_shape=jax.ShapeDtypeStruct((P, out_dim), jnp.bfloat16),
        grid_spec=pltpu.PrefetchScalarGridSpec(
            num_scalar_prefetch=0,
            grid=(P // tm, nj),
            in_specs=[
                # (tm, 32) row tile; same block index across j -> one DMA per i.
                pl.BlockSpec((tm, pk), lambda i, j: (i, 0)),
                # Resident weights (constant block index -> DMA'd once).
                pl.BlockSpec(w1m.shape, lambda i, j: (0, 0)),   # (32, 128)
                pl.BlockSpec(w2m.shape, lambda i, j: (0, 0)),   # (128, 128)
                pl.BlockSpec(b2m.shape, lambda i, j: (0, 0)),   # (1, 128)
                # conv_t weight / bias blocked along the 3200-wide output axis.
                pl.BlockSpec((C_PAD, tn), lambda i, j: (0, j)),  # (128, tn)
                pl.BlockSpec((1, tn), lambda i, j: (0, j)),      # (1, tn)
            ],
            # (tm, tn) lane-dense bf16 tile (tn multiple of 128).
            out_specs=pl.BlockSpec((tm, tn), lambda i, j: (i, j)),
            # conv1+conv2 result cached across the j axis.
            scratch_shapes=[pltpu.VMEM((tm, C_PAD), jnp.bfloat16)],
        ),
        compiler_params=pltpu.CompilerParams(
            dimension_semantics=("parallel", "arbitrary"),
            # Explicit budget: working set is ~tm*3 KiB (<=12 MiB at tm=4096),
            # 48 MiB is comfortably above that and below every generation's
            # physical VMEM (v7x: 64 MiB per TensorCore).
            vmem_limit_bytes=48 * 1024 * 1024,
        ),
    )(patches, w1m, w2m, b2m, wtm, btm)


def model_forward(x, params, *, tm=2048, tn=640):
    """x: (N, 1, H, W) NCHW float32, H and W multiples of 5.  Returns NCHW f32.

    VMEM working set ~ tm * 3 KiB (bf16 output tile double-buffered at width
    tn=640, bf16 f1 scratch, bf16 patch tile, resident weights ~1 MiB):
      tm=2048 -> ~6 MiB  : fits every generation, even v5e's 16 MiB default.
      tm=4096 -> ~12 MiB : still fine on v7x's 64 MiB/TC with the explicit
                           48 MiB vmem_limit; use for very large inputs.
    Do NOT revert to tn=3200 + f32 output at tm>=1024 on v7x (that was the
    ~26 MiB-per-buffer configuration the review flagged).
    """
    w1, w2, b2, wt, bt = params
    N, C, H, W = x.shape
    assert C == 1 and H % K == 0 and W % K == 0
    OH, OW = H // K, W // K
    C1 = w1.shape[0]      # 127
    Cout = wt.shape[1]    # 127
    P = N * OH * OW

    # Effective row tile: at most tm, sublane-aligned; pad P up to a multiple.
    tm_eff = min(tm, max(8, ((P + 7) // 8) * 8))
    P_pad = ((P + tm_eff - 1) // tm_eff) * tm_eff

    # --- glue: non-overlapping 5x5 patches -> (P_pad, 32) bf16 (25 -> 32 pad) ---
    patches = x.reshape(N, OH, K, OW, K).transpose(0, 1, 3, 2, 4).reshape(P, K * K)
    patches = jnp.pad(patches, ((0, P_pad - P), (0, PK - K * K))).astype(jnp.bfloat16)

    # --- glue: flatten + zero-pad (127 -> 128) weights into matmul form ---
    # conv1 weight (127, 1, 5, 5) -> (32, 128) (zero rows 25..31, zero col 127)
    w1m = jnp.pad(w1.reshape(C1, K * K).T,
                  ((0, PK - K * K), (0, C_PAD - C1))).astype(jnp.bfloat16)
    # conv2 weight (127, 127, 1, 1) -> (ic, oc) padded to (128, 128)
    w2m = jnp.pad(w2.reshape(C1, C1).T,
                  ((0, C_PAD - C1), (0, C_PAD - C1))).astype(jnp.bfloat16)
    b2m = jnp.pad(b2, (0, C_PAD - C1)).reshape(1, C_PAD).astype(jnp.float32)
    # conv_t weight (C_in=127, C_out=127, 5, 5) -> (128, 3200), columns (c, kh, kw)
    wt_pad = jnp.pad(wt, ((0, C_PAD - C1), (0, C_PAD - Cout), (0, 0), (0, 0)))
    wtm = wt_pad.reshape(C_PAD, OUT_W).astype(jnp.bfloat16)
    bt_pad = jnp.pad(bt, (0, C_PAD - Cout))
    btm = jnp.broadcast_to(bt_pad[:, None, None],
                           (C_PAD, K, K)).reshape(1, OUT_W).astype(jnp.float32)

    out_flat = fused_forward_pallas(patches, w1m, w2m, b2m, wtm, btm,
                                    tm=tm_eff, tn=tn)

    # --- glue: bf16 (P, 3200) -> NCHW f32.  Slice + transpose + convert fuse
    # into a single XLA pass (2B read + 4B write of the largest tensor instead
    # of the previous f32 4B+4B on top of a 4B kernel store).
    # TODO(synk): an NHWC consumer could take out_flat directly (with wtm/btm
    # columns reordered to (kh, kw, c)) and skip this transpose entirely.
    out = out_flat[:P].reshape(N, OH, OW, C_PAD, K, K)[:, :, :, :Cout]
    out = out.transpose(0, 3, 1, 4, 2, 5).reshape(N, Cout, OH * K, OW * K)
    return out.astype(jnp.float32)


def _reference(x, params):
    """Pure-jnp f32 reference using the same patch-matmul algebra."""
    w1, w2, b2, wt, bt = params
    N, C, H, W = x.shape
    OH, OW = H // K, W // K
    C1 = w1.shape[0]
    Cout = wt.shape[1]
    patches = x.reshape(N, OH, K, OW, K).transpose(0, 1, 3, 2, 4).reshape(N * OH * OW, K * K)
    m1 = patches @ w1.reshape(C1, K * K).T
    m1 = jnp.where(m1 > 0, m1, NEG_SLOPE * m1)
    f1 = m1 @ w2.reshape(C1, C1).T + b2[None, :]
    f1 = jnp.maximum(f1, 0.0)
    f2 = f1 @ wt.reshape(C1, Cout * K * K) \
        + jnp.broadcast_to(bt[:, None, None], (Cout, K, K)).reshape(1, Cout * K * K)
    f2 = jnp.maximum(f2, 0.0)
    out = f2.reshape(N, OH, OW, Cout, K, K).transpose(0, 3, 1, 4, 2, 5)
    return out.reshape(N, Cout, OH * K, OW * K)


if __name__ == "__main__":
    key = jax.random.PRNGKey(0)
    k_x, k_w1, k_w2, k_b2, k_wt, k_bt = jax.random.split(key, 6)

    # Small input consistent with the module: NCHW, 1 input channel, spatial
    # multiples of 5 so conv1 (k=5, s=5) is valid.  (The original x0=(3,1,5,4)
    # is invalid for a k=5 conv in PyTorch.)  P = 2*10*10 = 200 rows; the
    # column grid axis still runs 5 steps so the split path is exercised.
    N, H, W = 2, 50, 50
    x = jax.random.normal(k_x, (N, 1, H, W), dtype=jnp.float32)

    C1 = 127
    w1 = jax.random.normal(k_w1, (C1, 1, 5, 5), dtype=jnp.float32) * 0.1    # conv1 weight
    w2 = jax.random.normal(k_w2, (C1, C1, 1, 1), dtype=jnp.float32) * 0.05  # conv2 weight
    b2 = jax.random.normal(k_b2, (C1,), dtype=jnp.float32) * 0.05           # conv2 bias
    wt = jax.random.normal(k_wt, (C1, C1, 5, 5), dtype=jnp.float32) * 0.05  # conv_t weight
    bt = jax.random.normal(k_bt, (C1,), dtype=jnp.float32) * 0.05           # conv_t bias
    params = (w1, w2, b2, wt, bt)

    out = model_forward(x, params)
    out = jax.block_until_ready(out)
    assert out.shape == (N, C1, H, W), out.shape

    ref = _reference(x, params)
    # bf16 MXU operands + bf16 kernel output (intentional precision choice for
    # an HBM-writeback-bound kernel) -> loosened tolerance vs f32 reference.
    assert jnp.allclose(out, ref, atol=3e-2, rtol=3e-2), "mismatch vs reference"

    print("KERNEL_OK")
</pallas_src>

<mosaic_0001>
module attributes {stable_mosaic.version = 11 : i64} {
  func.func @_fused_kernel(%arg0: i32, %arg1: i32, %arg2: memref<200x32xbf16, #tpu.memory_space<vmem>>, %arg3: memref<32x128xbf16, #tpu.memory_space<vmem>>, %arg4: memref<128x128xbf16, #tpu.memory_space<vmem>>, %arg5: memref<1x128xf32, #tpu.memory_space<vmem>>, %arg6: memref<128x640xbf16, #tpu.memory_space<vmem>>, %arg7: memref<1x640xf32, #tpu.memory_space<vmem>>, %arg8: memref<200x640xbf16, #tpu.memory_space<vmem>>, %arg9: memref<200x128xbf16, #tpu.memory_space<vmem>>) attributes {dimension_semantics = [#tpu.dimension_semantics<parallel>, #tpu.dimension_semantics<arbitrary>], iteration_bounds = array<i64: 1, 5>, scalar_prefetch = 0 : i64, scratch_operands = 1 : i64, tpu.core_type = #tpu.core_type<tc>, window_params = [{transform_indices = @transform_0, window_bounds = array<i64: 200, 32>}, {pipeline_mode = #tpu.pipeline_mode<synchronous>, transform_indices = @transform_1, window_bounds = array<i64: 32, 128>}, {pipeline_mode = #tpu.pipeline_mode<synchronous>, transform_indices = @transform_2, window_bounds = array<i64: 128, 128>}, {pipeline_mode = #tpu.pipeline_mode<synchronous>, transform_indices = @transform_3, window_bounds = array<i64: 1, 128>}, {transform_indices = @transform_4, window_bounds = array<i64: 128, 640>}, {transform_indices = @transform_5, window_bounds = array<i64: 1, 640>}, {transform_indices = @transform_6, window_bounds = array<i64: 200, 640>}]} {
    %c0_i32 = arith.constant 0 : i32
    %0 = arith.cmpi eq, %arg1, %c0_i32 : i32
    %1 = arith.extui %0 : i1 to i32
    %c0_i32_0 = arith.constant 0 : i32
    %2 = arith.cmpi ne, %1, %c0_i32_0 : i32
    scf.if %2 {
      %c0_9 = arith.constant 0 : index
      %c0_10 = arith.constant 0 : index
      %13 = vector.load %arg2[%c0_9, %c0_10] : memref<200x32xbf16, #tpu.memory_space<vmem>>, vector<200x32xbf16>
      %c0_11 = arith.constant 0 : index
      %c0_12 = arith.constant 0 : index
      %14 = vector.load %arg3[%c0_11, %c0_12] : memref<32x128xbf16, #tpu.memory_space<vmem>>, vector<32x128xbf16>
      %cst_13 = arith.constant dense<0.000000e+00> : vector<200x128xf32>
      %15 = tpu.matmul %13, %14, %cst_13 {dimension_numbers = #tpu.dot_dimension_numbers<[1], [0], [0], [1], [0, 0, 1, 1], [], []>} : vector<200x32xbf16>, vector<32x128xbf16>, vector<200x128xf32> -> vector<200x128xf32>
      %cst_14 = arith.constant 0.000000e+00 : f32
      %16 = vector.broadcast %cst_14 : f32 to vector<200x128xf32>
      %17 = arith.cmpf ogt, %15, %16 : vector<200x128xf32>
      %cst_15 = arith.constant 0.00999999977 : f32
      %18 = vector.broadcast %cst_15 : f32 to vector<200x128xf32>
      %19 = arith.mulf %18, %15 : vector<200x128xf32>
      %20 = arith.select %17, %15, %19 : vector<200x128xi1>, vector<200x128xf32>
      %21 = arith.truncf %20 : vector<200x128xf32> to vector<200x128xbf16>
      %c0_16 = arith.constant 0 : index
      %c0_17 = arith.constant 0 : index
      %22 = vector.load %arg4[%c0_16, %c0_17] : memref<128x128xbf16, #tpu.memory_space<vmem>>, vector<128x128xbf16>
      %cst_18 = arith.constant dense<0.000000e+00> : vector<200x128xf32>
      %23 = tpu.matmul %21, %22, %cst_18 {dimension_numbers = #tpu.dot_dimension_numbers<[1], [0], [0], [1], [0, 0, 1, 1], [], []>} : vector<200x128xbf16>, vector<128x128xbf16>, vector<200x128xf32> -> vector<200x128xf32>
      %c0_19 = arith.constant 0 : index
      %c0_20 = arith.constant 0 : index
      %24 = vector.load %arg5[%c0_19, %c0_20] : memref<1x128xf32, #tpu.memory_space<vmem>>, vector<1x128xf32>
      %25 = vector.broadcast %24 : vector<1x128xf32> to vector<200x128xf32>
      %26 = arith.addf %23, %25 : vector<200x128xf32>
      %cst_21 = arith.constant 0.000000e+00 : f32
      %27 = vector.broadcast %cst_21 : f32 to vector<200x128xf32>
      %28 = arith.maximumf %26, %27 : vector<200x128xf32>
      %29 = arith.truncf %28 : vector<200x128xf32> to vector<200x128xbf16>
      %c0_22 = arith.constant 0 : index
      %c0_23 = arith.constant 0 : index
      %30 = vector.load %arg9[%c0_22, %c0_23] : memref<200x128xbf16, #tpu.memory_space<vmem>>, vector<200x128xbf16>
      tpu.vector_store %arg9[%c0_22, %c0_23], %29 {strides = array<i32>} : memref<200x128xbf16, #tpu.memory_space<vmem>>, vector<200x128xbf16>,
    } else {
    }
    %c0 = arith.constant 0 : index
    %c0_1 = arith.constant 0 : index
    %3 = vector.load %arg9[%c0, %c0_1] : memref<200x128xbf16, #tpu.memory_space<vmem>>, vector<200x128xbf16>
    %c0_2 = arith.constant 0 : index
    %c0_3 = arith.constant 0 : index
    %4 = vector.load %arg6[%c0_2, %c0_3] : memref<128x640xbf16, #tpu.memory_space<vmem>>, vector<128x640xbf16>
    %cst = arith.constant dense<0.000000e+00> : vector<200x640xf32>
    %5 = tpu.matmul %3, %4, %cst {dimension_numbers = #tpu.dot_dimension_numbers<[1], [0], [0], [1], [0, 0, 1, 1], [], []>} : vector<200x128xbf16>, vector<128x640xbf16>, vector<200x640xf32> -> vector<200x640xf32>
    %c0_4 = arith.constant 0 : index
    %c0_5 = arith.constant 0 : index
    %6 = vector.load %arg7[%c0_4, %c0_5] : memref<1x640xf32, #tpu.memory_space<vmem>>, vector<1x640xf32>
    %7 = vector.broadcast %6 : vector<1x640xf32> to vector<200x640xf32>
    %8 = arith.addf %5, %7 : vector<200x640xf32>
    %cst_6 = arith.constant 0.000000e+00 : f32
    %9 = vector.broadcast %cst_6 : f32 to vector<200x640xf32>
    %10 = arith.maximumf %8, %9 : vector<200x640xf32>
    %11 = arith.truncf %10 : vector<200x640xf32> to vector<200x640xbf16>
    %c0_7 = arith.constant 0 : index
    %c0_8 = arith.constant 0 : index
    %12 = vector.load %arg8[%c0_7, %c0_8] : memref<200x640xbf16, #tpu.memory_space<vmem>>, vector<200x640xbf16>
    tpu.vector_store %arg8[%c0_7, %c0_8], %11 {strides = array<i32>} : memref<200x640xbf16, #tpu.memory_space<vmem>>, vector<200x640xbf16>,
    return
  }
  func.func @transform_0(%arg0: i32, %arg1: i32) -> (i32, i32) {
    %c0_i32 = arith.constant 0 : i32
    %c0_i32_0 = arith.constant 0 : i32
    return %arg0, %c0_i32 : i32, i32
  }
  func.func @transform_1(%arg0: i32, %arg1: i32) -> (i32, i32) {
    %c0_i32 = arith.constant 0 : i32
    %c0_i32_0 = arith.constant 0 : i32
    %c0_i32_1 = arith.constant 0 : i32
    return %c0_i32, %c0_i32_0 : i32, i32
  }
  func.func @transform_2(%arg0: i32, %arg1: i32) -> (i32, i32) {
    %c0_i32 = arith.constant 0 : i32
    %c0_i32_0 = arith.constant 0 : i32
    %c0_i32_1 = arith.constant 0 : i32
    return %c0_i32, %c0_i32_0 : i32, i32
  }
  func.func @transform_3(%arg0: i32, %arg1: i32) -> (i32, i32) {
    %c0_i32 = arith.constant 0 : i32
    %c0_i32_0 = arith.constant 0 : i32
    %c0_i32_1 = arith.constant 0 : i32
    return %c0_i32, %c0_i32_0 : i32, i32
  }
  func.func @transform_4(%arg0: i32, %arg1: i32) -> (i32, i32) {
    %c0_i32 = arith.constant 0 : i32
    %c0_i32_0 = arith.constant 0 : i32
    return %c0_i32, %arg1 : i32, i32
  }
  func.func @transform_5(%arg0: i32, %arg1: i32) -> (i32, i32) {
    %c0_i32 = arith.constant 0 : i32
    %c0_i32_0 = arith.constant 0 : i32
    return %c0_i32, %arg1 : i32, i32
  }
  func.func @transform_6(%arg0: i32, %arg1: i32) -> (i32, i32) {
    %c0_i32 = arith.constant 0 : i32
    return %arg0, %arg1 : i32, i32
  }
}

</mosaic_0001>

<bundles_post_ra>
// kernel: tpu_custom_call.1
= control target key start
LH: loop header
LB: loop body
LE: loop exit
PB: predicated region body
PF: predicated region fallthrough
CT: control target
= control target key end

     0   :  { %s4709_s0 = inlined_call_operand.vmem [shape: bf16[200,32], index: 0, kind: input, shape index: {}]   ;;  %s4710_s1 = inlined_call_operand.hbm [shape: bf16[32,128], index: 1, kind: input, shape index: {}]   ;;  %s4711_s2 = inlined_call_operand.hbm [shape: bf16[128,128], index: 2, kind: input, shape index: {}]   ;;  %s4712_s3 = inlined_call_operand.hbm [shape: f32[1,128], index: 3, kind: input, shape index: {}]   ;;  %s4713_s4 = inlined_call_operand.hbm [shape: bf16[128,3200], index: 4, kind: input, shape index: {}]   ;;  %s4714_s5 = inlined_call_operand.hbm [shape: f32[1,3200], index: 5, kind: input, shape index: {}]   ;;  %s4715_s6 = inlined_call_operand.hbm [shape: bf16[200,3200], index: 6, kind: output, shape index: {}]  }
   0x1   :  { %4735 = sst [smem:[#allocation22_spill]] %s4709_s0 }
   0x2   :  { %4736 = sst [smem:[#allocation23_spill]] %s4711_s2 }
   0x3   :  { %4737 = sst [smem:[#allocation24_spill]] %s4713_s4 }
   0x4   :  { %4738 = sst [smem:[#allocation25_spill]] %s4715_s6 }
   0x5   :  { %11 = vsyncpa [#allocation4], 0 }
   0x6   :  { %12 = vsyncpa [#allocation7], 0 }
   0x7   :  { %13 = vsyncpa [#allocation10], 0 }
   0x8   :  { %15 = vsyncpa [#allocation10 + $0x1], 0 }
   0x9   :  { %16 = vsyncpa [#allocation5], 0 }
   0xa   :  { %18 = vsyncpa [#allocation5 + $0x1], 0  ;;  %s3893_s21 = smov 0   ;;  %s3895_s22 = smov 0  }
   0xb   :  { %s3897_s23 = smov 0   ;;  %s3899_s24 = smov 0  }
   0xc   :  { %s3901_s25 = smov 0   ;;  %s3903_s26 = smov 0  }
   0xd LB: > { %4739 = sst [smem:[#allocation17_spill]] %s3817_s21  ;;  %s3924_s27 = sadd.s32 4294967295, %s3837_s26   ;;  %s3837_s26 = sphi %s3903_s26, %s24_s26   ;;  %s3833_s25 = sphi %s3901_s25, %s4785_s25   ;;  %s3829_s24 = sphi %s3899_s24, %s4784_s24   ;;  %s3825_s23 = sphi %s3897_s23, %s4783_s23   ;;  %s3821_s22 = sphi %s3895_s22, %s4782_s22   ;;  %s3817_s21 = sphi %s3893_s21, %s4781_s21  }
   0xe   : > { %4740 = sst [smem:[#allocation18_spill]] %s3829_s24  ;;  %s2733_s28 = sadd.s32 4294967294, %s3837_s26  }
   0xf   : > { %p139_p0 = scmp.ne.s32.totalorder %s3825_s23, %s3821_s22  ;;  %p140_p1 = scmp.eq.s32.totalorder %s3837_s26, 0 }
  0x10   : > { %p145_p2 = scmp.ne.s32.totalorder %s3821_s22, %s3817_s21  ;;  %p4716_p3 = scmp.eq.s32.totalorder %s3924_s27, 0 }
  0x11   : > { %p197_p4 = scmp.eq.s32.totalorder %s3924_s27, 4  ;;  %p3935_p5 = por %p140_p1, %p139_p0 }
  0x12   : > { %p203_p6 = scmp.eq.s32.totalorder %s2733_s28, 4  ;;  %p3941_p7 = por %p4716_p3, %p145_p2 }
  0x13   : > { %p3945_p8 = por %p197_p4, %p139_p0  ;;  %p2734_p10 = scmp.ge.s32.totalorder %s3837_s26, 1 }
  0x14   : > { %s4742_s7 = scalar_select %p3941_p7, 1, 0 }
  0x15   : > { %s4743_s8 = scalar_select %p3945_p8, 1, 0 }
  0x16   : > { %p3949_p9 = por %p203_p6, %p145_p2  ;;  %p210_p11 = scmp.lt.s32.totalorder %s3837_s26, 6 }
  0x17   : > { %4744 = sst [smem:[#allocation19_spill]] %s4743_s8  ;;  %s3839_s11 = smov [#allocation6]  }
  0x18   : > { %s4745_s9 = scalar_select %p3949_p9, 1, 0 }
  0x19   : > { %p3955_p12 = pnand %p2734_p10, %p210_p11  ;;  %s244_s12 = sshll.u32 %s3839_s11, 4  ;;  %s245_s12 = int_to_ptr.vmem [resolvable:$true] %s244_s12 }
  0x1a   : > { %4746 = sst [smem:[#allocation20_spill]] %s4745_s9  ;;  %p3442_p0 = scmp.lt.s32.totalorder %s3837_s26, 5 }
  0x1b   : > { %s4747_s10 = scalar_select %p3955_p12, 1, 0 }
  0x1c   : > { %p3418_p13 = pneg %p3955_p12  ;;  %p3970_p2 = pnand %p3442_p0, %p3935_p5 }
  0x1d   : > { %s33_s15 = sadd.s32 1, %s3833_s25  ;;  %s4751_s2 = sld [smem:[#allocation23_spill]] }
  0x1e   : > { %p3964_p1 = pnand %p3418_p13, %p4716_p3  ;;  %p3975_p4 = scmp.ge.s32.totalorder %s33_s15, 5 }
  0x1f   : > { %s4749_s14 = scalar_select %p3970_p2, 1, 0 }
  0x20   : > { %s4748_s13 = scalar_select %p3964_p1, 1, 0 }
  0x21   : > { %s4750_s16 = scalar_select %p3975_p4, 1, 0 }
  0x22   : > { %p3987_p10 = pneg %p3964_p1 }
  0x23   : > { %s3603_s19 = scalar_lea.hbm %s4751_s2, 1024 }
  0x24   : > { %p3604_p6 = scmp.ne.s32.totalorder %s4751_s2, %s3603_s19  ;;  %p3610_p13 = scmp.lt.u32.totalorder %s3603_s19, %s4751_s2 }
  0x26   : > { %p3606_p5 = pnand %p3987_p10, %p3604_p6 }
  0x28   : > { %p3607_p11 = pneg %p3606_p5 }
  0x2a   : > { %p3612_p0 = pnand %p3610_p13, %p3607_p11 }
  0x2c   : > { %3615 = shalt.err (!%p3612_p0)
}
  0x2d   : > { %s3616_s17 = scalar_lea.vmem %s245_s12, 1024  ;;  %p3624_p7 = scmp.lt.s32.totalorder %s245_s12, %s245_s12 }
  0x2e   : > { %p3617_p3 = scmp.ne.s32.totalorder %s245_s12, %s3616_s17  ;;  %p3625_p12 = scmp.lt.s32.totalorder %s3616_s17, %s3616_s17 }
  0x30   : > { %p3619_p9 = pnand %p3617_p3, %p3987_p10  ;;  %p3626_p2 = por %p3625_p12, %p3624_p7 }
  0x32   : > { %p3620_p8 = pneg %p3619_p9 }
  0x34   : > { %p3627_p4 = pnand %p3626_p2, %p3620_p8 }
  0x36   : > { %3630 = shalt.err (!%p3627_p4)
}
  0x37   : > { %s4730_s18 = smov 64   ;;  %s4731_s29 = smov 4  }
  0x38   : > { %3424 = dma.hbm_to_vmem [thread:$0]  (!%p3964_p1), %s4751_s2, 1024, %s245_s12, [#allocation7], %s4730_s18, %s4730_s18, %s4731_s29  }
  0x39   : > { %s269_s28 = sand.u32 1, %s3837_s26   ;;  %p4753_p3 = scmp.ne.s32.totalorder %s4750_s16, 0 }
  0x3a   : > { %s4727_s11 = sand.u32 1, %s3825_s23   ;;  %s2940_s21 = smul.u32 320, %s3833_s25 }
  0x3b   : > { %s4787_s15 = smov (%p4753_p3, %s33_s15), 0  ;;  %s3395_s9 = smul.u32 320, %s4727_s11 }
  0x3c   : > { %4754 = sst [smem:[#allocation21_spill]] %s4787_s15  ;;  %s129_s17 = ssub.s32 %s3833_s25, %s4787_s15 }
  0x3d   : > { %p130_p7 = scmp.eq.s32.totalorder %s129_s17, 0  ;;  %s4755_s6 = sadd.s32 1, %s3825_s23 }
  0x3e   : > { %s4756_s4 = sld [smem:[#allocation24_spill]]  ;;  %s273_s16 = scalar_lea.vmem [#allocation9], %s3395_s9 }
  0x3f   : > { %s4020_s8 = scalar_select %p130_p7, %s3825_s23, %s4755_s6  }
  0x40   : > { %s280_s19 = sshll.u32 %s273_s16, 4  ;;  %s4029_s20 = scalar_lea.sflag [#allocation10], %s269_s28  ;;  %s4027_s19 = int_to_ptr.vmem [resolvable:$true] %s280_s19 }
  0x41   : > { %p4757_p9 = scmp.ne.s32.totalorder %s4749_s14, 0 }
  0x43   : > { %p4733_p12 = pneg %p4757_p9 }
  0x44   : > { %s4025_s12 = scalar_lea.hbm %s4756_s4, %s2940_s21  ;;  %s3636_s21 = scalar_lea.hbm %s4756_s4, 25600 }
  0x45   : > { %s3631_s17 = scalar_lea.hbm %s4025_s12, 5120  ;;  %p3637_p6 = scmp.lt.u32.totalorder %s4025_s12, %s4756_s4 }
  0x46   : > { %p3632_p8 = scmp.ne.s32.totalorder %s4025_s12, %s3631_s17  ;;  %p3638_p5 = scmp.lt.u32.totalorder %s3636_s21, %s3631_s17 }
  0x47   : > { %p3640_p13 = scmp.lt.u32.totalorder %s3631_s17, %s4025_s12 }
  0x48   : > { %p3634_p2 = pnand %p4733_p12, %p3632_p8  ;;  %p3639_p11 = por %p3638_p5, %p3637_p6 }
  0x4a   : > { %p3635_p4 = pneg %p3634_p2  ;;  %p3641_p0 = por %p3640_p13, %p3639_p11 }
  0x4c   : > { %p3642_p3 = pnand %p3641_p0, %p3635_p4 }
  0x4e   : > { %3645 = shalt.err (!%p3642_p3)
}
  0x4f   : > { %s3646_s9 = scalar_lea.vmem %s4027_s19, 5120  ;;  %s3842_s28 = smov [#allocation9]  }
  0x50   : > { %p3647_p7 = scmp.ne.s32.totalorder %s4027_s19, %s3646_s9  ;;  %s3651_s16 = sshll.u32 %s3842_s28, 4  ;;  %s3652_s16 = int_to_ptr.vmem [resolvable:$false] %s3651_s16 }
  0x51   : > { %s3653_s11 = scalar_lea.vmem %s3652_s16, 10240  ;;  %p3654_p1 = scmp.lt.s32.totalorder %s4027_s19, %s3652_s16 }
  0x52   : > { %p3649_p8 = pnand %p3647_p7, %p4733_p12  ;;  %p3655_p6 = scmp.lt.s32.totalorder %s3653_s11, %s3646_s9 }
  0x54   : > { %p3650_p2 = pneg %p3649_p8  ;;  %p3656_p5 = por %p3655_p6, %p3654_p1 }
  0x56   : > { %p3657_p11 = pnand %p3656_p5, %p3650_p2 }
  0x58   : > { %3660 = shalt.err (!%p3657_p11)
}
  0x59   : > { %s3843_s17 = smov 1600   ;;  %s3844_s0 = smov 320  }
  0x5a   : > { %s3845_s6 = smov 20   ;;  %s3846_s21 = smov [#allocation3]  }
  0x5b   : > { %3431 = dma.hbm_to_vmem [thread:$0]  (!%p4757_p9), %s4025_s12, 5120, %s4027_s19, %s4029_s20, %s3843_s17, %s3844_s0, %s3845_s6  }
  0x5c   : > { %s231_s24 = sshll.u32 %s3846_s21, 4  ;;  %s3847_s28 = smov [#allocation8]   ;;  %s232_s24 = int_to_ptr.vmem [resolvable:$true] %s231_s24 }
  0x5d   : > { %s258_s18 = sshll.u32 %s3847_s28, 4  ;;  %s3661_s11 = scalar_lea.hbm %s4710_s1, 256  ;;  %s259_s18 = int_to_ptr.vmem [resolvable:$true] %s258_s18 }
  0x5e   : > { %p3662_p1 = scmp.ne.s32.totalorder %s4710_s1, %s3661_s11  ;;  %p3668_p0 = scmp.lt.u32.totalorder %s3661_s11, %s4710_s1 }
  0x60   : > { %p3664_p4 = pnand %p3662_p1, %p3987_p10 }
  0x62   : > { %p3665_p13 = pneg %p3664_p4 }
  0x64   : > { %p3670_p3 = pnand %p3668_p0, %p3665_p13 }
  0x66   : > { %3673 = shalt.err (!%p3670_p3)
}
  0x67   : > { %s3674_s12 = scalar_lea.vmem %s232_s24, 256  ;;  %p3682_p6 = scmp.lt.s32.totalorder %s232_s24, %s232_s24 }
  0x68   : > { %p3675_p7 = scmp.ne.s32.totalorder %s232_s24, %s3674_s12  ;;  %p3683_p5 = scmp.lt.s32.totalorder %s3674_s12, %s3674_s12 }
  0x6a   : > { %p3677_p8 = pnand %p3675_p7, %p3987_p10  ;;  %p3684_p11 = por %p3683_p5, %p3682_p6 }
  0x6c   : > { %p3678_p2 = pneg %p3677_p8 }
  0x6e   : > { %p3685_p12 = pnand %p3684_p11, %p3678_p2 }
  0x70   : > { %3688 = shalt.err (!%p3685_p12)
}
  0x71   : > { %p4758_p1 = scmp.ne.s32.totalorder %s4748_s13, 0  ;;  %s4759_s2 = smov 4  }
  0x72   : > { %s4760_s29 = smov 64   ;;  %s4761_s19 = sand.u32 1, %s3825_s23  }
  0x73   : > { %3421 = dma.hbm_to_vmem [thread:$0]  (!%p4758_p1), %s4710_s1, 256, %s232_s24, [#allocation4], %s4760_s29, %s4760_s29, %s4759_s2  }
  0x74   : > { %s3396_s17 = smul.u32 5, %s4761_s19  ;;  %s3689_s21 = scalar_lea.hbm %s4712_s3, 16 }
  0x75   : > { %p3690_p12 = scmp.ne.s32.totalorder %s4712_s3, %s3689_s21  ;;  %p3696_p0 = scmp.lt.u32.totalorder %s3689_s21, %s4712_s3 }
  0x77   : > { %p3692_p4 = pnand %p3690_p12, %p3987_p10 }
  0x79   : > { %p3693_p13 = pneg %p3692_p4 }
  0x7b   : > { %p3698_p3 = pnand %p3696_p0, %p3693_p13 }
  0x7d   : > { %3701 = shalt.err (!%p3698_p3)
}
  0x7e   : > { %s3702_s24 = scalar_lea.vmem %s259_s18, 16  ;;  %s3709_s12 = scalar_lea.vmem %s259_s18, 32 }
  0x7f   : > { %p3703_p7 = scmp.ne.s32.totalorder %s259_s18, %s3702_s24  ;;  %p3710_p6 = scmp.lt.s32.totalorder %s259_s18, %s259_s18 }
  0x80   : > { %p3711_p5 = scmp.lt.s32.totalorder %s3709_s12, %s3702_s24 }
  0x81   : > { %p3705_p8 = pnand %p3703_p7, %p3987_p10 }
  0x82   : > { %p3712_p11 = por %p3711_p5, %p3710_p6 }
  0x83   : > { %p3706_p2 = pneg %p3705_p8 }
  0x85   : > { %p3713_p9 = pnand %p3712_p11, %p3706_p2 }
  0x87   : > { %3716 = shalt.err (!%p3713_p9)
}
  0x88   : > { %3427 = dma.hbm_to_vmem [thread:$0]  (!%p4758_p1), %s4712_s3, 16, %s259_s18, [#allocation7]  }
  0x89   : > { %s2941_s4 = smul.u32 80, %s3833_s25  ;;  %s294_s15 = scalar_lea.vmem [#allocation11], %s3396_s17 }
  0x8a   : > { %s302_s19 = sshll.u32 %s294_s15, 4  ;;  %p4762_p12 = scmp.ne.s32.totalorder %s4749_s14, 0  ;;  %s303_s19 = int_to_ptr.vmem [resolvable:$true] %s302_s19 }
  0x8b   : > { %s300_s6 = scalar_lea.hbm %s4714_s5, %s2941_s4  ;;  %s3722_s16 = scalar_lea.hbm %s4714_s5, 400 }
  0x8c   : > { %s3717_s21 = scalar_lea.hbm %s300_s6, 80  ;;  %p4763_p9 = pneg %p4762_p12 }
  0x8d   : > { %p3718_p10 = scmp.ne.s32.totalorder %s300_s6, %s3717_s21  ;;  %p3723_p1 = scmp.lt.u32.totalorder %s300_s6, %s4714_s5 }
  0x8e   : > { %p3724_p0 = scmp.lt.u32.totalorder %s3722_s16, %s3717_s21  ;;  %p3726_p7 = scmp.lt.u32.totalorder %s3717_s21, %s300_s6 }
  0x8f   : > { %p3720_p4 = pnand %p3718_p10, %p4763_p9 }
  0x90   : > { %p3725_p3 = por %p3724_p0, %p3723_p1 }
  0x91   : > { %p3721_p13 = pneg %p3720_p4 }
  0x92   : > { %p3727_p8 = por %p3726_p7, %p3725_p3 }
  0x94   : > { %p3728_p2 = pnand %p3727_p8, %p3721_p13 }
  0x96   : > { %3731 = shalt.err (!%p3728_p2)
}
  0x97   : > { %s3732_s17 = scalar_lea.vmem %s303_s19, 80  ;;  %p4764_p5 = pmov %p4763_p9 }
  0x98   : > { %p3733_p6 = scmp.ne.s32.totalorder %s303_s19, %s3732_s17  ;;  %s3848_s11 = smov [#allocation11]  }
  0x99   : > { %s3737_s24 = sshll.u32 %s3848_s11, 4  ;;  %s3738_s24 = int_to_ptr.vmem [resolvable:$false] %s3737_s24 }
  0x9a   : > { %p3735_p11 = pnand %p3733_p6, %p4764_p5  ;;  %s3739_s12 = scalar_lea.vmem %s3738_s24, 160 }
  0x9b   : > { %p3740_p9 = scmp.lt.s32.totalorder %s303_s19, %s3738_s24  ;;  %p3741_p4 = scmp.lt.s32.totalorder %s3739_s12, %s3732_s17 }
  0x9c   : > { %p3736_p10 = pneg %p3735_p11 }
  0x9d   : > { %p3742_p0 = por %p3741_p4, %p3740_p9 }
  0x9f   : > { %p3743_p1 = pnand %p3742_p0, %p3736_p10 }
  0xa1   : > { %3746 = shalt.err (!%p3743_p1)
}
  0xa2   : > { %3434 = dma.hbm_to_vmem [thread:$0]  (!%p4762_p12), %s300_s6, 80, %s303_s19, %s4029_s20  }
  0xa3   : > { %p4765_p13 = scmp.ne.s32.totalorder %s4747_s10, 0 }
  0xa4   : > { %p4766_p3 = scmp.eq.s32.totalorder (!%p4765_p13), %s3924_s27, 0 }
  0xa5   : > { %311 = sbr.rel (%p4765_p13) target bundleno = 1151 (0x47f), region = 44 }
  0xac   : > { %3800 = dma.done.wait (%p4766_p3), [#allocation4], 256   ;;  %p4767_p7 = pmov %p4766_p3 }
  0xad   : > { %p4768_p8 = pmov %p4766_p3 }
  0xae   : > { %3802 = vsyncadd (%p4767_p7), [#allocation4], 4294967040 }
  0xaf   : > { %3804 = dma.done.wait (%p4768_p8), [#allocation7], 1040   ;;  %p4769_p2 = pmov %p4766_p3 }
  0xb0   : > { %s325_s14 = sand.u32 1, %s3924_s27   ;;  %s4129_s20 = sand.u32 1, %s3821_s22  }
  0xb1   : > { %3806 = vsyncadd (%p4769_p2), [#allocation7], 4294966256  ;;  %s3397_s10 = smul.u32 320, %s4129_s20  ;;  %s326_s2 = scalar_lea.sflag [#allocation10], %s325_s14 }
  0xb2   : > { %p4770_p12 = scmp.ne.s32.totalorder %s4742_s7, 0 }
  0xb3   : > { %s4132_s29 = scalar_lea.vmem [#allocation9], %s3397_s10 }
  0xb4   : > { %3808 = dma.done.wait (%p4770_p12), %s326_s2, 5200  }
  0xb5   : > { %3810 = vsyncadd (%p4770_p12), %s326_s2, 4294962096  ;;  %s3398_s4 = smul.u32 5, %s4129_s20  ;;  %s4771_s27 = sld [smem:[#allocation18_spill]] }
  0xb6   : > { %s3399_s15 = smul.u32 500, %s4129_s20 }
  0xb7   : > { %s4140_s19 = scalar_lea.vmem [#allocation11], %s3398_s4 }
  0xb8   : > { %s4142_s30 = scalar_lea.vmem [#allocation12], %s3399_s15 }
  0xbb   : > { %p2746_p6 = scmp.ne.s32.totalorder %s4771_s27, 0 }
  0xbc   : > { %v3511_v0 = vld [vmem:[#allocation3] sm:$0xff] (!%p2746_p6)   ;;  %v3849_v1 = vmov (!%p2746_p6), 0.0   ;;  %v3512_v2 = vld [vmem:[#allocation3 + $0x8] sm:$0xff] (!%p2746_p6)   ;;  %vm3850_vm0 = vmmov (!%p2746_p6), 0   ;;  %s4772_s6 = sld [smem:[#allocation22_spill]] (!%p2746_p6)  ;;  %vm496_vm1 = vcmask (!%p2746_p6), 261120  }
  0xbd   : > { %391 = sbr.rel (%p2746_p6) target bundleno = 731 (0x2db), region = 68  ;;  %3171 = vmatprep.subr.bf16.mxu0 (!%p2746_p6), %v3849_v1  ;;  %3363 = vmatprep.subr.bf16.mxu1 (!%p2746_p6), %v3849_v1  ;;  %v3526_v5 = vld [vmem:[#allocation6] sm:$0xff] (!%p2746_p6)   ;;  %v3527_v6 = vld [vmem:[#allocation6 + $0x8] sm:$0xff] (!%p2746_p6)   ;;  %v3528_v8 = vld [vmem:[#allocation6 + $0x10] sm:$0xff] (!%p2746_p6)  }
  0xbe   : > { %3172 = vmatpush3.bf16.msra.mxu0 (!%p2746_p6), %v3511_v0  ;;  %3175 = vmatprep.mubr.msk.bf16.mxu0 (!%p2746_p6), %vm3850_vm0, %v3849_v1  ;;  %v3529_v9 = vld [vmem:[#allocation6 + $0x18] sm:$0xff] (!%p2746_p6)   ;;  %v3530_v11 = vld [vmem:[#allocation6 + $0x20] sm:$0xff] (!%p2746_p6)   ;;  %v3531_v12 = vld [vmem:[#allocation6 + $0x28] sm:$0xff] (!%p2746_p6)  }
  0xbf   : > { %3173 = vmatprep.subr.bf16.mxu0 (!%p2746_p6), %v3849_v1  ;;  %3247 = vmatprep.mubr.msk.bf16.mxu1 (!%p2746_p6), %vm3850_vm0, %v3849_v1  ;;  %v3532_v20 = vld [vmem:[#allocation6 + $0x30] sm:$0xff] (!%p2746_p6)   ;;  %v3533_v22 = vld [vmem:[#allocation6 + $0x38] sm:$0xff] (!%p2746_p6)  }
  0xc0   : > { %3371 = vmatpush3.bf16.msra.mxu1 (!%p2746_p6), %v3526_v5 }
  0xc1   : > { %3364 = vmatprep.subr.bf16.mxu1 (!%p2746_p6), %v3849_v1 }
  0xc2   : > { %v3513_v3 = vld [vmem:[%s4772_s6] sm:$0xff] (!%p2746_p6)   ;;  %3174 = vmatpush3.bf16.msra.mxu0 (!%p2746_p6), %v3512_v2  ;;  %v3514_v4 = vld [vmem:[%s4772_s6 + $0x8] sm:$0xff] (!%p2746_p6)   ;;  %v3515_v7 = vld [vmem:[%s4772_s6 + $0x10] sm:$0xff] (!%p2746_p6)  }
  0xc3   : > { %3227 = vmatprep.subr.bf16.mxu0 (!%p2746_p6), %v3849_v1  ;;  %v3516_v10 = vld [vmem:[%s4772_s6 + $0x18] sm:$0xff] (!%p2746_p6)   ;;  %v3517_v13 = vld [vmem:[%s4772_s6 + $0x20] sm:$0xff] (!%p2746_p6)   ;;  %v3518_v14 = vld [vmem:[%s4772_s6 + $0x28] sm:$0xff] (!%p2746_p6)  }
  0xc4   : > { %3372 = vmatpush3.bf16.msra.mxu1 %v3527_v6  ;;  %v3519_v15 = vld [vmem:[%s4772_s6 + $0x30] sm:$0xff]   ;;  %v3520_v16 = vld [vmem:[%s4772_s6 + $0x38] sm:$0xff]   ;;  %v3521_v17 = vld [vmem:[%s4772_s6 + $0x40] sm:$0xff]  }
  0xc5   : > { %3176 = vmatmul.mubr.msk.bf16.vlgmr.msra.gmra.mrb[0].mxu0 %vm496_vm1, %v3513_v3  ;;  %3365 = vmatprep.subr.bf16.mxu1 %v3849_v1  ;;  %v3522_v18 = vld [vmem:[%s4772_s6 + $0x48] sm:$0xff]   ;;  %v3523_v19 = vld [vmem:[%s4772_s6 + $0x50] sm:$0xff]   ;;  %v3524_v21 = vld [vmem:[%s4772_s6 + $0x58] sm:$0xff]  }
  0xc6   : > { %3179 = vmatprep.mubr.msk.bf16.mxu0 %vm3850_vm0, %v3849_v1  ;;  %3228 = vmatpush3.bf16.msra.mxu0 %v3526_v5  ;;  %v3525_v23 = vld [vmem:[%s4772_s6 + $0x60] ss:$0 sps:$4 sm:$0xff]  }
  0xc7   : > { %3229 = vmatprep.subr.bf16.mxu0 %v3849_v1 }
  0xc8   : > { %3373 = vmatpush3.bf16.msra.mxu1 %v3528_v8 }
  0xc9   : > { %3366 = vmatprep.subr.bf16.mxu1 %v3849_v1 }
  0xca   : > { %3230 = vmatpush3.bf16.msra.mxu0 %v3527_v6 }
  0xcb   : > { %3231 = vmatprep.subr.bf16.mxu0 %v3849_v1 }
  0xcc   : > { %3374 = vmatpush3.bf16.msra.mxu1 %v3529_v9 }
  0xcd   : > { %3180 = vmatmul.mubr.msk.bf16.gmra.mrb[4].mxu0 %vm496_vm1, %v3514_v4  ;;  %3367 = vmatprep.subr.bf16.mxu1 %v3849_v1 }
  0xce   : > { %3183 = vmatprep.mubr.msk.bf16.mxu0 %vm3850_vm0, %v3849_v1  ;;  %3232 = vmatpush3.bf16.msra.mxu0 %v3528_v8 }
  0xcf   : > { %3233 = vmatprep.subr.bf16.mxu0 %v3849_v1 }
  0xd0   : > { %3375 = vmatpush3.bf16.msra.mxu1 %v3530_v11 }
  0xd1   : > { %3368 = vmatprep.subr.bf16.mxu1 %v3849_v1 }
  0xd2   : > { %3234 = vmatpush3.bf16.msra.mxu0 %v3529_v9 }
  0xd3   : > { %3235 = vmatprep.subr.bf16.mxu0 %v3849_v1 }
  0xd4   : > { %3376 = vmatpush3.bf16.msra.mxu1 %v3531_v12 }
  0xd5   : > { %3184 = vmatmul.mubr.msk.bf16.gmra.mrb[8].mxu0 %vm496_vm1, %v3515_v7  ;;  %3369 = vmatprep.subr.bf16.mxu1 %v3849_v1 }
  0xd6   : > { %3187 = vmatprep.mubr.msk.bf16.mxu0 %vm3850_vm0, %v3849_v1  ;;  %3236 = vmatpush3.bf16.msra.mxu0 %v3530_v11 }
  0xd7   : > { %3237 = vmatprep.subr.bf16.mxu0 %v3849_v1 }
  0xd8   : > { %3377 = vmatpush3.bf16.msra.mxu1 %v3532_v20 }
  0xd9   : > { %3370 = vmatprep.subr.bf16.mxu1 %v3849_v1 }
  0xda   : > { %3238 = vmatpush3.bf16.msra.mxu0 %v3531_v12 }
  0xdb   : > { %3239 = vmatprep.subr.bf16.mxu0 %v3849_v1 }
  0xdc   : > { %3378 = vmatpush3.bf16.msra.mxu1 %v3533_v22 }
  0xdd   : > { %3188 = vmatmul.mubr.msk.bf16.gmra.mrb[12].mxu0 %vm496_vm1, %v3516_v10 }
  0xde   : > { %3191 = vmatprep.mubr.msk.bf16.mxu0 %vm3850_vm0, %v3849_v1  ;;  %3240 = vmatpush3.bf16.msra.mxu0 %v3532_v20 }
  0xdf   : > { %3241 = vmatprep.subr.bf16.mxu0 %v3849_v1 }
  0xe2   : > { %3242 = vmatpush3.bf16.msra.mxu0 %v3533_v22 }
  0xe5   : > { %3192 = vmatmul.mubr.msk.bf16.gmra.mrb[16].mxu0 %vm496_vm1, %v3517_v13 }
  0xe6   : > { %3195 = vmatprep.mubr.msk.bf16.mxu0 %vm3850_vm0, %v3849_v1 }
  0xed   : > { %3196 = vmatmul.mubr.msk.bf16.gmra.mrb[20].mxu0 %vm496_vm1, %v3518_v14 }
  0xee   : > { %3199 = vmatprep.mubr.msk.bf16.mxu0 %vm3850_vm0, %v3849_v1 }
  0xf5   : > { %3200 = vmatmul.mubr.msk.bf16.gmra.mrb[24].mxu0 %vm496_vm1, %v3519_v15 }
  0xf6   : > { %3203 = vmatprep.mubr.msk.bf16.mxu0 %vm3850_vm0, %v3849_v1 }
  0xfd   : > { %3204 = vmatmul.mubr.msk.bf16.gmra.mrb[28].mxu0 %vm496_vm1, %v3520_v16 }
  0xfe   : > { %3207 = vmatprep.mubr.msk.bf16.mxu0 %vm3850_vm0, %v3849_v1 }
 0x105   : > { %3208 = vmatmul.mubr.msk.bf16.gmra.mrb[32].mxu0 %vm496_vm1, %v3521_v17 }
 0x106   : > { %3211 = vmatprep.mubr.msk.bf16.mxu0 %vm3850_vm0, %v3849_v1 }
 0x10d   : > { %3212 = vmatmul.mubr.msk.bf16.gmra.mrb[36].mxu0 %vm496_vm1, %v3522_v18 }
 0x10e   : > { %3215 = vmatprep.mubr.msk.bf16.mxu0 %vm3850_vm0, %v3849_v1 }
 0x115   : > { %3216 = vmatmul.mubr.msk.bf16.gmra.mrb[40].mxu0 %vm496_vm1, %v3523_v19 }
 0x116   : > { %3219 = vmatprep.mubr.msk.bf16.mxu0 %vm3850_vm0, %v3849_v1 }
 0x11d   : > { %3220 = vmatmul.mubr.msk.bf16.gmra.mrb[44].mxu0 %vm496_vm1, %v3524_v21 }
 0x11e   : > { %3223 = vmatprep.mubr.msk.bf16.mxu0 %vm3850_vm0, %v3849_v1 }
 0x125   : > { %3224 = vmatmul.mubr.msk.bf16.gmra.mrb[48].mxu0 %vm496_vm1, %v3525_v23 }
 0x126   : > { %3243 = vmatprep.mubr.msk.bf16.mxu0 %vm3850_vm0, %v3849_v1 }
 0x198   : > { %v570_v24 = vpop.f32.mrb[0].mxu0 }
 0x199   : > { %v697_v25 = vmul.f32 0.01, %v570_v24  ;;  %v3177_v26 = vpop.f32.mrb[1].mxu0  ;;  %vm672_vm2 = vcmp.gt.f32.partialorder %v570_v24, 0.0 }
 0x19a   : > { %v573_v27 = vpop.f32.mrb[2].mxu0 }
 0x19b   : > { %vm673_vm3 = vcmp.gt.f32.partialorder %v573_v27, 0.0  ;;  %v698_v28 = vmul.f32 0.01, %v573_v27  ;;  %v3178_v29 = vpop.f32.mrb[3].mxu0  ;;  %v722_v30 = vsel %vm672_vm2, %v570_v24, %v697_v25 }
 0x19d   : > { %v723_v31 = vsel %vm673_vm3, %v573_v27, %v698_v28 }
 0x19e   : > { %v747_v32 = vpack.c.bf16 %v723_v31, %v722_v30 }
 0x1a0   : > { %v578_v33 = vpop.f32.mrb[4].mxu0  ;;  %3244 = vmatmul.mubr.bf16.vlgmr.msra.gmra.mrb[52].mxu0 %v747_v32 }
 0x1a1   : > { %v699_v34 = vmul.f32 0.01, %v578_v33  ;;  %v3181_v35 = vpop.f32.mrb[5].mxu0  ;;  %vm674_vm4 = vcmp.gt.f32.partialorder %v578_v33, 0.0 }
 0x1a2   : > { %v581_v36 = vpop.f32.mrb[6].mxu0 }
 0x1a3   : > { %vm675_vm5 = vcmp.gt.f32.partialorder %v581_v36, 0.0  ;;  %v700_v37 = vmul.f32 0.01, %v581_v36  ;;  %v3182_v38 = vpop.f32.mrb[7].mxu0  ;;  %v724_v39 = vsel %vm674_vm4, %v578_v33, %v699_v34 }
 0x1a5   : > { %v725_v40 = vsel %vm675_vm5, %v581_v36, %v700_v37 }
 0x1a6   : > { %v748_v41 = vpack.c.bf16 %v725_v40, %v724_v39 }
 0x1a8   : > { %v586_v42 = vpop.f32.mrb[8].mxu0  ;;  %3248 = vmatmul.mubr.bf16.vlgmr.msra.gmra.mrb[0].mxu1 %v748_v41 }
 0x1a9   : > { %v701_v43 = vmul.f32 0.01, %v586_v42  ;;  %v3185_v44 = vpop.f32.mrb[9].mxu0  ;;  %3251 = vmatprep.mubr.msk.bf16.mxu1 %vm3850_vm0, %v3849_v1  ;;  %vm676_vm6 = vcmp.gt.f32.partialorder %v586_v42, 0.0 }
 0x1aa   : > { %v589_v45 = vpop.f32.mrb[10].mxu0 }
 0x1ab   : > { %vm677_vm7 = vcmp.gt.f32.partialorder %v589_v45, 0.0  ;;  %v702_v46 = vmul.f32 0.01, %v589_v45  ;;  %v3186_v47 = vpop.f32.mrb[11].mxu0  ;;  %v726_v48 = vsel %vm676_vm6, %v586_v42, %v701_v43 }
 0x1ad   : > { %v727_v49 = vsel %vm677_vm7, %v589_v45, %v702_v46 }
 0x1ae   : > { %v749_v50 = vpack.c.bf16 %v727_v49, %v726_v48 }
 0x1b0   : > { %v594_v51 = vpop.f32.mrb[12].mxu0  ;;  %3252 = vmatmul.mubr.bf16.gmra.mrb[4].mxu1 %v749_v50 }
 0x1b1   : > { %v703_v52 = vmul.f32 0.01, %v594_v51  ;;  %v3189_v53 = vpop.f32.mrb[13].mxu0  ;;  %3255 = vmatprep.mubr.msk.bf16.mxu1 %vm3850_vm0, %v3849_v1  ;;  %vm678_vm8 = vcmp.gt.f32.partialorder %v594_v51, 0.0 }
 0x1b2   : > { %v597_v54 = vpop.f32.mrb[14].mxu0 }
 0x1b3   : > { %vm679_vm9 = vcmp.gt.f32.partialorder %v597_v54, 0.0  ;;  %v704_v55 = vmul.f32 0.01, %v597_v54  ;;  %v3190_v56 = vpop.f32.mrb[15].mxu0  ;;  %v728_v57 = vsel %vm678_vm8, %v594_v51, %v703_v52 }
 0x1b5   : > { %v729_v58 = vsel %vm679_vm9, %v597_v54, %v704_v55 }
 0x1b6   : > { %v750_v59 = vpack.c.bf16 %v729_v58, %v728_v57 }
 0x1b8   : > { %v602_v60 = vpop.f32.mrb[16].mxu0  ;;  %3256 = vmatmul.mubr.bf16.gmra.mrb[8].mxu1 %v750_v59 }
 0x1b9   : > { %v705_v61 = vmul.f32 0.01, %v602_v60  ;;  %v3193_v62 = vpop.f32.mrb[17].mxu0  ;;  %3259 = vmatprep.mubr.msk.bf16.mxu1 %vm3850_vm0, %v3849_v1  ;;  %vm680_vm10 = vcmp.gt.f32.partialorder %v602_v60, 0.0 }
 0x1ba   : > { %v605_v63 = vpop.f32.mrb[18].mxu0 }
 0x1bb   : > { %vm681_vm11 = vcmp.gt.f32.partialorder %v605_v63, 0.0  ;;  %v706_v0 = vmul.f32 0.01, %v605_v63  ;;  %v3194_v2 = vpop.f32.mrb[19].mxu0  ;;  %v730_v3 = vsel %vm680_vm10, %v602_v60, %v705_v61 }
 0x1bd   : > { %v731_v4 = vsel %vm681_vm11, %v605_v63, %v706_v0 }
 0x1be   : > { %v751_v5 = vpack.c.bf16 %v731_v4, %v730_v3 }
 0x1c0   : > { %v610_v6 = vpop.f32.mrb[20].mxu0  ;;  %3260 = vmatmul.mubr.bf16.gmra.mrb[12].mxu1 %v751_v5 }
 0x1c1   : > { %v707_v7 = vmul.f32 0.01, %v610_v6  ;;  %v3197_v8 = vpop.f32.mrb[21].mxu0  ;;  %3263 = vmatprep.mubr.msk.bf16.mxu1 %vm3850_vm0, %v3849_v1  ;;  %vm682_vm12 = vcmp.gt.f32.partialorder %v610_v6, 0.0 }
 0x1c2   : > { %v613_v9 = vpop.f32.mrb[22].mxu0 }
 0x1c3   : > { %vm683_vm13 = vcmp.gt.f32.partialorder %v613_v9, 0.0  ;;  %v708_v10 = vmul.f32 0.01, %v613_v9  ;;  %v3198_v11 = vpop.f32.mrb[23].mxu0  ;;  %v732_v12 = vsel %vm682_vm12, %v610_v6, %v707_v7 }
 0x1c5   : > { %v733_v13 = vsel %vm683_vm13, %v613_v9, %v708_v10 }
 0x1c6   : > { %v752_v14 = vpack.c.bf16 %v733_v13, %v732_v12  ;;  %v4267_v13 = vld [vmem:[#allocation8] ss:$0 sm:$0xff] }
 0x1c8   : > { %v618_v15 = vpop.f32.mrb[24].mxu0  ;;  %3264 = vmatmul.mubr.bf16.gmra.mrb[16].mxu1 %v752_v14 }
 0x1c9   : > { %v709_v16 = vmul.f32 0.01, %v618_v15  ;;  %v3201_v17 = vpop.f32.mrb[25].mxu0  ;;  %3267 = vmatprep.mubr.msk.bf16.mxu1 %vm3850_vm0, %v3849_v1  ;;  %vm684_vm14 = vcmp.gt.f32.partialorder %v618_v15, 0.0 }
 0x1ca   : > { %v621_v18 = vpop.f32.mrb[26].mxu0 }
 0x1cb   : > { %vm685_vm15 = vcmp.gt.f32.partialorder %v621_v18, 0.0  ;;  %v710_v19 = vmul.f32 0.01, %v621_v18  ;;  %v3202_v20 = vpop.f32.mrb[27].mxu0  ;;  %v734_v21 = vsel %vm684_vm14, %v618_v15, %v709_v16 }
 0x1cd   : > { %v735_v22 = vsel %vm685_vm15, %v621_v18, %v710_v19 }
 0x1ce   : > { %v753_v23 = vpack.c.bf16 %v735_v22, %v734_v21 }
 0x1d0   : > { %v626_v24 = vpop.f32.mrb[28].mxu0  ;;  %3268 = vmatmul.mubr.bf16.gmra.mrb[20].mxu1 %v753_v23 }
 0x1d1   : > { %v711_v25 = vmul.f32 0.01, %v626_v24  ;;  %v3205_v26 = vpop.f32.mrb[29].mxu0  ;;  %3271 = vmatprep.mubr.msk.bf16.mxu1 %vm3850_vm0, %v3849_v1  ;;  %vm686_vm1 = vcmp.gt.f32.partialorder %v626_v24, 0.0 }
 0x1d2   : > { %v629_v27 = vpop.f32.mrb[30].mxu0 }
 0x1d3   : > { %vm687_vm2 = vcmp.gt.f32.partialorder %v629_v27, 0.0  ;;  %v712_v28 = vmul.f32 0.01, %v629_v27  ;;  %v3206_v29 = vpop.f32.mrb[31].mxu0  ;;  %v736_v30 = vsel %vm686_vm1, %v626_v24, %v711_v25 }
 0x1d5   : > { %v737_v31 = vsel %vm687_vm2, %v629_v27, %v712_v28 }
 0x1d6   : > { %v754_v32 = vpack.c.bf16 %v737_v31, %v736_v30 }
 0x1d8   : > { %v634_v33 = vpop.f32.mrb[32].mxu0  ;;  %3272 = vmatmul.mubr.bf16.gmra.mrb[24].mxu1 %v754_v32 }
 0x1d9   : > { %v713_v34 = vmul.f32 0.01, %v634_v33  ;;  %v3209_v35 = vpop.f32.mrb[33].mxu0  ;;  %3275 = vmatprep.mubr.msk.bf16.mxu1 %vm3850_vm0, %v3849_v1  ;;  %vm688_vm3 = vcmp.gt.f32.partialorder %v634_v33, 0.0 }
 0x1da   : > { %v637_v36 = vpop.f32.mrb[34].mxu0 }
 0x1db   : > { %vm689_vm4 = vcmp.gt.f32.partialorder %v637_v36, 0.0  ;;  %v714_v37 = vmul.f32 0.01, %v637_v36  ;;  %v3210_v38 = vpop.f32.mrb[35].mxu0  ;;  %v738_v39 = vsel %vm688_vm3, %v634_v33, %v713_v34 }
 0x1dd   : > { %v739_v40 = vsel %vm689_vm4, %v637_v36, %v714_v37 }
 0x1de   : > { %v755_v41 = vpack.c.bf16 %v739_v40, %v738_v39 }
 0x1e0   : > { %v642_v42 = vpop.f32.mrb[36].mxu0  ;;  %3276 = vmatmul.mubr.bf16.gmra.mrb[28].mxu1 %v755_v41 }
 0x1e1   : > { %v715_v43 = vmul.f32 0.01, %v642_v42  ;;  %v3213_v44 = vpop.f32.mrb[37].mxu0  ;;  %3279 = vmatprep.mubr.msk.bf16.mxu1 %vm3850_vm0, %v3849_v1  ;;  %vm690_vm5 = vcmp.gt.f32.partialorder %v642_v42, 0.0 }
 0x1e2   : > { %v645_v45 = vpop.f32.mrb[38].mxu0 }
 0x1e3   : > { %vm691_vm6 = vcmp.gt.f32.partialorder %v645_v45, 0.0  ;;  %v716_v46 = vmul.f32 0.01, %v645_v45  ;;  %v3214_v47 = vpop.f32.mrb[39].mxu0  ;;  %v740_v48 = vsel %vm690_vm5, %v642_v42, %v715_v43 }
 0x1e5   : > { %v741_v49 = vsel %vm691_vm6, %v645_v45, %v716_v46 }
 0x1e6   : > { %v756_v50 = vpack.c.bf16 %v741_v49, %v740_v48 }
 0x1e8   : > { %v650_v51 = vpop.f32.mrb[40].mxu0  ;;  %3280 = vmatmul.mubr.bf16.gmra.mrb[32].mxu1 %v756_v50 }
 0x1e9   : > { %v717_v52 = vmul.f32 0.01, %v650_v51  ;;  %v3217_v53 = vpop.f32.mrb[41].mxu0  ;;  %3283 = vmatprep.mubr.msk.bf16.mxu1 %vm3850_vm0, %v3849_v1  ;;  %vm692_vm7 = vcmp.gt.f32.partialorder %v650_v51, 0.0 }
 0x1ea   : > { %v653_v54 = vpop.f32.mrb[42].mxu0 }
 0x1eb   : > { %vm693_vm8 = vcmp.gt.f32.partialorder %v653_v54, 0.0  ;;  %v718_v55 = vmul.f32 0.01, %v653_v54  ;;  %v3218_v56 = vpop.f32.mrb[43].mxu0  ;;  %v742_v57 = vsel %vm692_vm7, %v650_v51, %v717_v52 }
 0x1ed   : > { %v743_v58 = vsel %vm693_vm8, %v653_v54, %v718_v55 }
 0x1ee   : > { %v757_v59 = vpack.c.bf16 %v743_v58, %v742_v57 }
 0x1f0   : > { %v658_v60 = vpop.f32.mrb[44].mxu0  ;;  %3284 = vmatmul.mubr.bf16.gmra.mrb[36].mxu1 %v757_v59 }
 0x1f1   : > { %v719_v61 = vmul.f32 0.01, %v658_v60  ;;  %v3221_v62 = vpop.f32.mrb[45].mxu0  ;;  %3287 = vmatprep.mubr.msk.bf16.mxu1 %vm3850_vm0, %v3849_v1  ;;  %vm694_vm9 = vcmp.gt.f32.partialorder %v658_v60, 0.0 }
 0x1f2   : > { %v661_v63 = vpop.f32.mrb[46].mxu0 }
 0x1f3   : > { %vm695_vm10 = vcmp.gt.f32.partialorder %v661_v63, 0.0  ;;  %v720_v0 = vmul.f32 0.01, %v661_v63  ;;  %v3222_v2 = vpop.f32.mrb[47].mxu0  ;;  %v744_v3 = vsel %vm694_vm9, %v658_v60, %v719_v61 }
 0x1f5   : > { %v745_v4 = vsel %vm695_vm10, %v661_v63, %v720_v0 }
 0x1f6   : > { %v758_v5 = vpack.c.bf16 %v745_v4, %v744_v3 }
 0x1f8   : > { %v666_v6 = vpop.f32.mrb[48].mxu0  ;;  %3288 = vmatmul.mubr.bf16.gmra.mrb[40].mxu1 %v758_v5 }
 0x1f9   : > { %vm696_vm11 = vcmp.gt.f32.partialorder %v666_v6, 0.0  ;;  %v721_v7 = vmul.f32 0.01, %v666_v6  ;;  %v3225_v8 = vpop.f32.mrb[49].mxu0  ;;  %3291 = vmatprep.mubr.msk.bf16.mxu1 %vm3850_vm0, %v3849_v1 }
 0x1fa   : > { %v669_v9 = vpop.f32.mrb[50].mxu0 }
 0x1fb   : > { %v746_v10 = vsel %vm696_vm11, %v666_v6, %v721_v7  ;;  %v3226_v11 = vpop.f32.mrb[51].mxu0 }
 0x1fc   : > { %v759_v12 = vpack.c.bf16 %v746_v10, %v746_v10 }
 0x200   : > { %3292 = vmatmul.mubr.bf16.gmra.mrb[44].mxu1 %v759_v12 }
 0x273   : > { %v865_v14 = vpop.f32.mrb[52].mxu0 }
 0x274   : > { %v866_v15 = vadd.f32 %v4267_v13, %v865_v14  ;;  %v3245_v16 = vpop.f32.mrb[53].mxu0 }
 0x275   : > { %v868_v17 = vpop.f32.mrb[54].mxu0 }
 0x276   : > { %v869_v18 = vadd.f32 %v4267_v13, %v868_v17  ;;  %v3246_v19 = vpop.f32.mrb[55].mxu0  ;;  %v967_v20 = vmax.f32 %v866_v15, 0.0 }
 0x278   : > { %v968_v21 = vmax.f32 %v869_v18, 0.0 }
 0x27a   : > { %v3046_v22 = vpack.c.bf16 %v968_v21, %v967_v20 }
 0x27b   : > { %v873_v23 = vpop.f32.mrb[0].mxu1 }
 0x27c   : > { %3047 = vst [vmem:[#allocation2] sm:$0xff] %v3046_v22   ;;  %v874_v1 = vadd.f32 %v4267_v13, %v873_v23  ;;  %v3249_v24 = vpop.f32.mrb[1].mxu1 }
 0x27d   : > { %v876_v25 = vpop.f32.mrb[2].mxu1 }
 0x27e   : > { %v877_v26 = vadd.f32 %v4267_v13, %v876_v25  ;;  %v3250_v27 = vpop.f32.mrb[3].mxu1  ;;  %v969_v28 = vmax.f32 %v874_v1, 0.0 }
 0x280   : > { %v970_v29 = vmax.f32 %v877_v26, 0.0 }
 0x282   : > { %v3051_v30 = vpack.c.bf16 %v970_v29, %v969_v28 }
 0x283   : > { %v881_v31 = vpop.f32.mrb[4].mxu1 }
 0x284   : > { %3103 = vst [vmem:[#allocation2 + $0x8] sm:$0xff] %v3051_v30   ;;  %v882_v32 = vadd.f32 %v4267_v13, %v881_v31  ;;  %v3253_v33 = vpop.f32.mrb[5].mxu1 }
 0x285   : > { %v884_v34 = vpop.f32.mrb[6].mxu1 }
 0x286   : > { %v885_v35 = vadd.f32 %v4267_v13, %v884_v34  ;;  %v3254_v36 = vpop.f32.mrb[7].mxu1  ;;  %v971_v37 = vmax.f32 %v882_v32, 0.0 }
 0x288   : > { %v972_v38 = vmax.f32 %v885_v35, 0.0 }
 0x28a   : > { %v3056_v39 = vpack.c.bf16 %v972_v38, %v971_v37 }
 0x28b   : > { %v889_v40 = vpop.f32.mrb[8].mxu1 }
 0x28c   : > { %3104 = vst [vmem:[#allocation2 + $0x10] sm:$0xff] %v3056_v39   ;;  %v890_v41 = vadd.f32 %v4267_v13, %v889_v40  ;;  %v3257_v42 = vpop.f32.mrb[9].mxu1 }
 0x28d   : > { %v892_v43 = vpop.f32.mrb[10].mxu1 }
 0x28e   : > { %v893_v44 = vadd.f32 %v4267_v13, %v892_v43  ;;  %v3258_v45 = vpop.f32.mrb[11].mxu1  ;;  %v973_v46 = vmax.f32 %v890_v41, 0.0 }
 0x290   : > { %v974_v47 = vmax.f32 %v893_v44, 0.0 }
 0x292   : > { %v3061_v48 = vpack.c.bf16 %v974_v47, %v973_v46 }
 0x293   : > { %v897_v49 = vpop.f32.mrb[12].mxu1 }
 0x294   : > { %3105 = vst [vmem:[#allocation2 + $0x18] sm:$0xff] %v3061_v48   ;;  %v898_v50 = vadd.f32 %v4267_v13, %v897_v49  ;;  %v3261_v51 = vpop.f32.mrb[13].mxu1 }
 0x295   : > { %v900_v52 = vpop.f32.mrb[14].mxu1 }
 0x296   : > { %v901_v53 = vadd.f32 %v4267_v13, %v900_v52  ;;  %v3262_v54 = vpop.f32.mrb[15].mxu1  ;;  %v975_v55 = vmax.f32 %v898_v50, 0.0 }
 0x298   : > { %v976_v56 = vmax.f32 %v901_v53, 0.0 }
 0x29a   : > { %v3066_v57 = vpack.c.bf16 %v976_v56, %v975_v55 }
 0x29b   : > { %v905_v58 = vpop.f32.mrb[16].mxu1 }
 0x29c   : > { %3106 = vst [vmem:[#allocation2 + $0x20] sm:$0xff] %v3066_v57   ;;  %v906_v59 = vadd.f32 %v4267_v13, %v905_v58  ;;  %v3265_v60 = vpop.f32.mrb[17].mxu1 }
 0x29d   : > { %v908_v61 = vpop.f32.mrb[18].mxu1 }
 0x29e   : > { %v909_v62 = vadd.f32 %v4267_v13, %v908_v61  ;;  %v3266_v63 = vpop.f32.mrb[19].mxu1  ;;  %v977_v0 = vmax.f32 %v906_v59, 0.0 }
 0x2a0   : > { %v978_v2 = vmax.f32 %v909_v62, 0.0 }
 0x2a2   : > { %v3071_v3 = vpack.c.bf16 %v978_v2, %v977_v0 }
 0x2a3   : > { %v913_v4 = vpop.f32.mrb[20].mxu1 }
 0x2a4   : > { %3107 = vst [vmem:[#allocation2 + $0x28] sm:$0xff] %v3071_v3   ;;  %v914_v5 = vadd.f32 %v4267_v13, %v913_v4  ;;  %v3269_v6 = vpop.f32.mrb[21].mxu1 }
 0x2a5   : > { %v916_v7 = vpop.f32.mrb[22].mxu1 }
 0x2a6   : > { %v917_v8 = vadd.f32 %v4267_v13, %v916_v7  ;;  %v3270_v9 = vpop.f32.mrb[23].mxu1  ;;  %v979_v10 = vmax.f32 %v914_v5, 0.0 }
 0x2a8   : > { %v980_v11 = vmax.f32 %v917_v8, 0.0 }
 0x2aa   : > { %v3076_v12 = vpack.c.bf16 %v980_v11, %v979_v10 }
 0x2ab   : > { %v921_v14 = vpop.f32.mrb[24].mxu1 }
 0x2ac   : > { %3108 = vst [vmem:[#allocation2 + $0x30] sm:$0xff] %v3076_v12   ;;  %v922_v15 = vadd.f32 %v4267_v13, %v921_v14  ;;  %v3273_v16 = vpop.f32.mrb[25].mxu1 }
 0x2ad   : > { %v924_v17 = vpop.f32.mrb[26].mxu1 }
 0x2ae   : > { %v925_v18 = vadd.f32 %v4267_v13, %v924_v17  ;;  %v3274_v19 = vpop.f32.mrb[27].mxu1  ;;  %v981_v20 = vmax.f32 %v922_v15, 0.0 }
 0x2b0   : > { %v982_v21 = vmax.f32 %v925_v18, 0.0 }
 0x2b2   : > { %v3081_v22 = vpack.c.bf16 %v982_v21, %v981_v20 }
 0x2b3   : > { %v929_v23 = vpop.f32.mrb[28].mxu1 }
 0x2b4   : > { %3109 = vst [vmem:[#allocation2 + $0x38] sm:$0xff] %v3081_v22   ;;  %v930_v1 = vadd.f32 %v4267_v13, %v929_v23  ;;  %v3277_v24 = vpop.f32.mrb[29].mxu1 }
 0x2b5   : > { %v932_v25 = vpop.f32.mrb[30].mxu1 }
 0x2b6   : > { %v933_v26 = vadd.f32 %v4267_v13, %v932_v25  ;;  %v3278_v27 = vpop.f32.mrb[31].mxu1  ;;  %v983_v28 = vmax.f32 %v930_v1, 0.0 }
 0x2b8   : > { %v984_v29 = vmax.f32 %v933_v26, 0.0 }
 0x2ba   : > { %v3086_v30 = vpack.c.bf16 %v984_v29, %v983_v28 }
 0x2bb   : > { %v937_v31 = vpop.f32.mrb[32].mxu1 }
 0x2bc   : > { %3110 = vst [vmem:[#allocation2 + $0x40] sm:$0xff] %v3086_v30   ;;  %v938_v32 = vadd.f32 %v4267_v13, %v937_v31  ;;  %v3281_v33 = vpop.f32.mrb[33].mxu1 }
 0x2bd   : > { %v940_v34 = vpop.f32.mrb[34].mxu1 }
 0x2be   : > { %v941_v35 = vadd.f32 %v4267_v13, %v940_v34  ;;  %v3282_v36 = vpop.f32.mrb[35].mxu1  ;;  %v985_v37 = vmax.f32 %v938_v32, 0.0 }
 0x2c0   : > { %v986_v38 = vmax.f32 %v941_v35, 0.0 }
 0x2c2   : > { %v3091_v39 = vpack.c.bf16 %v986_v38, %v985_v37 }
 0x2c3   : > { %v945_v40 = vpop.f32.mrb[36].mxu1 }
 0x2c4   : > { %3111 = vst [vmem:[#allocation2 + $0x48] sm:$0xff] %v3091_v39   ;;  %v946_v41 = vadd.f32 %v4267_v13, %v945_v40  ;;  %v3285_v42 = vpop.f32.mrb[37].mxu1 }
 0x2c5   : > { %v948_v43 = vpop.f32.mrb[38].mxu1 }
 0x2c6   : > { %v949_v44 = vadd.f32 %v4267_v13, %v948_v43  ;;  %v3286_v45 = vpop.f32.mrb[39].mxu1  ;;  %v987_v46 = vmax.f32 %v946_v41, 0.0 }
 0x2c8   : > { %v988_v47 = vmax.f32 %v949_v44, 0.0 }
 0x2ca   : > { %v3096_v48 = vpack.c.bf16 %v988_v47, %v987_v46 }
 0x2cb   : > { %v953_v49 = vpop.f32.mrb[40].mxu1 }
 0x2cc   : > { %3112 = vst [vmem:[#allocation2 + $0x50] sm:$0xff] %v3096_v48   ;;  %v954_v50 = vadd.f32 %v4267_v13, %v953_v49  ;;  %v3289_v51 = vpop.f32.mrb[41].mxu1 }
 0x2cd   : > { %v956_v52 = vpop.f32.mrb[42].mxu1 }
 0x2ce   : > { %v957_v53 = vadd.f32 %v4267_v13, %v956_v52  ;;  %v3290_v54 = vpop.f32.mrb[43].mxu1  ;;  %v989_v55 = vmax.f32 %v954_v50, 0.0 }
 0x2d0   : > { %v990_v56 = vmax.f32 %v957_v53, 0.0 }
 0x2d2   : > { %v3101_v57 = vpack.c.bf16 %v990_v56, %v989_v55 }
 0x2d3   : > { %v961_v58 = vpop.f32.mrb[44].mxu1 }
 0x2d4   : > { %3113 = vst [vmem:[#allocation2 + $0x58] sm:$0xff] %v3101_v57   ;;  %v962_v59 = vadd.f32 %v4267_v13, %v961_v58  ;;  %v3293_v60 = vpop.f32.mrb[45].mxu1 }
 0x2d5   : > { %v964_v61 = vpop.f32.mrb[46].mxu1 }
 0x2d6   : > { %v991_v62 = vmax.f32 %v962_v59, 0.0  ;;  %v3294_v63 = vpop.f32.mrb[47].mxu1 }
 0x2d8   : > { %v2966_v0 = vpack.c.bf16 %v991_v62, %v991_v62 }
 0x2da   : > { %1117 = vst [vmem:[#allocation2 + $0x60] sm:$0xf] %v2966_v0 }
 0x2db PF: > { %v3534_v2 = vld [vmem:[%s4132_s29 + $0x4] ss:$20 sps:$4 sm:$0xff]   ;;  %v3536_v3 = vld [vmem:[%s4132_s29] ss:$20 sps:$4 sm:$0xff]   ;;  %v3851_v4 = vmov 0   ;;  %v4313_v20 = vld [vmem:[#allocation2] sm:$0xff]   ;;  %v1193_v56 = vlaneseq }
 0x2dc   : > { %1534 = vmatprep.mubr.bf16.mxu0 %v3851_v4  ;;  %1604 = vmatprep.mubr.bf16.mxu1 %v3851_v4  ;;  %v3537_v13 = vld [vmem:[%s4132_s29 + $0x2c] ss:$20 sps:$4 sm:$0xff]   ;;  %v3539_v5 = vld [vmem:[%s4132_s29 + $0x28] ss:$20 sps:$4 sm:$0xff]   ;;  %v3542_v7 = vld [vmem:[%s4132_s29 + $0x50] ss:$20 sps:$4 sm:$0xff]  }
 0x2dd   : > { %1502 = vmatprep.subr.bf16.mxu0 %v3534_v2  ;;  %3379 = vmatprep.subr.bf16.mxu1 %v3534_v2  ;;  %v3540_v6 = vld [vmem:[%s4132_s29 + $0x54] ss:$20 sps:$4 sm:$0xff]   ;;  %v3543_v8 = vld [vmem:[%s4132_s29 + $0x7c] ss:$20 sps:$4 sm:$0xff]   ;;  %v3545_v9 = vld [vmem:[%s4132_s29 + $0x78] ss:$20 sps:$4 sm:$0xff]  }
 0x2de   : > { %1503 = vmatpush1.bf16.msra.mxu0 %v3536_v3  ;;  %3387 = vmatpush1.bf16.msra.mxu1 %v3536_v3  ;;  %v3546_v10 = vld [vmem:[%s4132_s29 + $0xa4] ss:$20 sps:$4 sm:$0xff]   ;;  %v3548_v11 = vld [vmem:[%s4132_s29 + $0xa0] ss:$20 sps:$4 sm:$0xff]   ;;  %v3551_v14 = vld [vmem:[%s4132_s29 + $0xc8] ss:$20 sps:$4 sm:$0xff]  }
 0x2df   : > { %1504 = vmatprep.subr.bf16.mxu0 %v3537_v13  ;;  %3380 = vmatprep.subr.bf16.mxu1 %v3537_v13  ;;  %v3549_v12 = vld [vmem:[%s4132_s29 + $0xcc] ss:$20 sps:$4 sm:$0xff]   ;;  %v3552_v15 = vld [vmem:[%s4132_s29 + $0xf4] ss:$20 sps:$4 sm:$0xff]   ;;  %v3554_v16 = vld [vmem:[%s4132_s29 + $0xf0] ss:$20 sps:$4 sm:$0xff]  }
 0x2e0   : > { %v3555_v17 = vld [vmem:[%s4132_s29 + $0x11c] ss:$20 sps:$4 sm:$0xff]   ;;  %v3557_v18 = vld [vmem:[%s4132_s29 + $0x118] ss:$20 sps:$4 sm:$0xff]   ;;  %v4315_v21 = vld [vmem:[#allocation2 + $0x38] sm:$0xff]   ;;  %v3852_v23 = vmov 0.0  }
 0x2e1   : > { %v3563_v19 = vld [vmem:[%s4132_s29 + $0xc] ss:$20 sps:$4 sm:$0xff]   ;;  %v3559_v22 = vld [vmem:[%s4132_s29 + $0x10] ss:$20 sps:$4 sm:$0xff]   ;;  %v3561_v1 = vld [vmem:[%s4132_s29 + $0x8] ss:$20 sps:$4 sm:$0xff]  }
 0x2e2   : > { %1505 = vmatpush1.bf16.msra.mxu0 %v3539_v5  ;;  %3388 = vmatpush1.bf16.msra.mxu1 %v3539_v5  ;;  %v3569_v24 = vld [vmem:[%s4132_s29 + $0x34] ss:$20 sps:$4 sm:$0xff]   ;;  %v3565_v25 = vld [vmem:[%s4132_s29 + $0x38] ss:$20 sps:$4 sm:$0xff]   ;;  %v3567_v27 = vld [vmem:[%s4132_s29 + $0x30] ss:$20 sps:$4 sm:$0xff]  }
 0x2e3   : > { %1506 = vmatprep.subr.bf16.mxu0 %v3540_v6  ;;  %3381 = vmatprep.subr.bf16.mxu1 %v3540_v6  ;;  %v4326_v26 = vld [vmem:[#allocation2 + $0x8] sm:$0xff]   ;;  %v4331_v29 = vld [vmem:[#allocation2 + $0x40] sm:$0xff]   ;;  %v4345_v36 = vld [vmem:[#allocation2 + $0x10] sm:$0xff]   ;;  %vm3853_vm0 = vmmov 0   ;;  %v4429_v57 = vshrl.u32 %v1193_v56, 7  ;;  %s4774_s17 = sld [smem:[#allocation19_spill]] }
 0x2e4   : > { %v3574_v28 = vld [vmem:[%s4132_s29 + $0x5c] ss:$20 sps:$4 sm:$0xff]   ;;  %v3570_v30 = vld [vmem:[%s4132_s29 + $0x60] ss:$20 sps:$4 sm:$0xff]   ;;  %v3572_v31 = vld [vmem:[%s4132_s29 + $0x58] ss:$20 sps:$4 sm:$0xff]  }
 0x2e5   : > { %v3580_v32 = vld [vmem:[%s4132_s29 + $0x84] ss:$20 sps:$4 sm:$0xff]   ;;  %v3576_v33 = vld [vmem:[%s4132_s29 + $0x88] ss:$20 sps:$4 sm:$0xff]   ;;  %v3578_v34 = vld [vmem:[%s4132_s29 + $0x80] ss:$20 sps:$4 sm:$0xff]  }
 0x2e6   : > { %1507 = vmatpush1.bf16.msra.mxu0 %v3542_v7  ;;  %3389 = vmatpush1.bf16.msra.mxu1 %v3542_v7  ;;  %v3585_v35 = vld [vmem:[%s4132_s29 + $0xac] ss:$20 sps:$4 sm:$0xff]   ;;  %v4347_v37 = vld [vmem:[#allocation2 + $0x48] sm:$0xff]   ;;  %v3583_v39 = vld [vmem:[%s4132_s29 + $0xa8] ss:$20 sps:$4 sm:$0xff]   ;;  %v1195_v58 = vsub.s32 0, %v4429_v57 }
 0x2e7   : > { %1508 = vmatprep.subr.bf16.mxu0 %v3543_v8  ;;  %3382 = vmatprep.subr.bf16.mxu1 %v3543_v8  ;;  %v3582_v38 = vld [vmem:[%s4132_s29 + $0xb0] ss:$20 sps:$4 sm:$0xff]   ;;  %v3591_v40 = vld [vmem:[%s4132_s29 + $0xd4] ss:$20 sps:$4 sm:$0xff]   ;;  %v3587_v41 = vld [vmem:[%s4132_s29 + $0xd8] ss:$20 sps:$4 sm:$0xff]  }
 0x2e8   : > { %v3589_v42 = vld [vmem:[%s4132_s29 + $0xd0] ss:$20 sps:$4 sm:$0xff]   ;;  %v4361_v45 = vld [vmem:[#allocation2 + $0x50] sm:$0xff]   ;;  %v3597_v54 = vld [vmem:[#allocation2 + $0x60] ss:$0 sps:$4 sm:$0xff]   ;;  %v1199_v60 = vsub.s32 1, %v4429_v57 }
 0x2e9   : > { %v3595_v43 = vld [vmem:[%s4132_s29 + $0xfc] ss:$20 sps:$4 sm:$0xff]   ;;  %v3577_v44 = vld [vmem:[#allocation2 + $0x18] sm:$0xff]   ;;  %v3593_v46 = vld [vmem:[%s4132_s29 + $0xf8] ss:$20 sps:$4 sm:$0xff]   ;;  %s2582_s11 = sshll.u32 %s4142_s30, 4  ;;  %s4660_s11 = int_to_ptr.vmem [resolvable:$true] %s2582_s11 }
 0x2ea   : > { %1509 = vmatpush1.bf16.msra.mxu0 %v3545_v9  ;;  %3390 = vmatpush1.bf16.msra.mxu1 %v3545_v9  ;;  %v3596_v47 = vld [vmem:[%s4132_s29 + $0x100] ss:$20 sps:$4 sm:$0xff]   ;;  %v3601_v48 = vld [vmem:[%s4132_s29 + $0x124] ss:$20 sps:$4 sm:$0xff]   ;;  %v3602_v50 = vld [vmem:[%s4132_s29 + $0x128] ss:$20 sps:$4 sm:$0xff]  }
 0x2eb   : > { %1510 = vmatprep.subr.bf16.mxu0 %v3546_v10  ;;  %3383 = vmatprep.subr.bf16.mxu1 %v3546_v10  ;;  %v3599_v49 = vld [vmem:[%s4132_s29 + $0x120] ss:$20 sps:$4 sm:$0xff]   ;;  %v3586_v51 = vld [vmem:[#allocation2 + $0x20] sm:$0xff]   ;;  %s4773_s29 = sld [smem:[#allocation18_spill]]  ;;  %s4775_s14 = sld [smem:[#allocation25_spill]] }
 0x2ec   : > { %v3588_v52 = vld [vmem:[#allocation2 + $0x58] sm:$0xff]   ;;  %v3592_v53 = vld [vmem:[#allocation2 + $0x28] sm:$0xff]   ;;  %v3598_v55 = vld [vmem:[#allocation2 + $0x30] sm:$0xff]   ;;  %s2566_s2 = scalar_lea.sflag [#allocation5], %s4129_s20  ;;  %s3747_s4 = scalar_lea.vmem %s4660_s11, 8000 }
 0x2ed   : > { %v4433_v59 = vld [vmem:[%s4140_s19] sm:$0x1f]  ;;  %p3748_p5 = scmp.ne.s32.totalorder %s4660_s11, %s3747_s4  ;;  %p4776_p11 = scmp.ne.s32.totalorder %s4774_s17, 0 }
 0x2ee   : > { %1511 = vmatpush1.bf16.msra.mxu0 %v3548_v11  ;;  %3391 = vmatpush1.bf16.msra.mxu1 %v3548_v11  ;;  %v4437_v61 = vrot.slane %v4433_v59, %v1195_v58  ;;  %v4440_v62 = vrot.slane %v4433_v59, %v1199_v60  ;;  %s3854_s15 = smov [#allocation12]  }
 0x2ef   : > { %1512 = vmatprep.subr.bf16.mxu0 %v3549_v12  ;;  %3384 = vmatprep.subr.bf16.mxu1 %v3549_v12  ;;  %p3749_p10 = pnand %p3748_p5, %p4776_p11  ;;  %s3751_s27 = sshll.u32 %s3854_s15, 4  ;;  %s3752_s27 = int_to_ptr.vmem [resolvable:$false] %s3751_s27 }
 0x2f0   : > { %s3753_s7 = scalar_lea.vmem %s3752_s27, 16000  ;;  %p3754_p4 = scmp.lt.s32.totalorder %s4660_s11, %s3752_s27 }
 0x2f1   : > { %s3042_s19 = smul.u32 320, %s4773_s29  ;;  %p3750_p9 = pneg %p3749_p10 }
 0x2f2   : > { %1513 = vmatpush1.bf16.msra.mxu0 %v3551_v14  ;;  %3392 = vmatpush1.bf16.msra.mxu1 %v3551_v14  ;;  %p3755_p0 = scmp.lt.s32.totalorder %s3753_s7, %s3747_s4 }
 0x2f3   : > { %1514 = vmatprep.subr.bf16.mxu0 %v3552_v15  ;;  %3385 = vmatprep.subr.bf16.mxu1 %v3552_v15  ;;  %s4658_s10 = scalar_lea.hbm %s4775_s14, %s3042_s19 }
 0x2f4   : > { %p3756_p1 = por %p3755_p0, %p3754_p4 }
 0x2f6   : > { %1515 = vmatpush1.bf16.msra.mxu0 %v3554_v16  ;;  %3393 = vmatpush1.bf16.msra.mxu1 %v3554_v16  ;;  %p3757_p13 = pnand %p3756_p1, %p3750_p9 }
 0x2f7   : > { %1516 = vmatprep.subr.bf16.mxu0 %v3555_v17  ;;  %3386 = vmatprep.subr.bf16.mxu1 %v3555_v17 }
 0x2fa   : > { %1517 = vmatpush1.bf16.msra.mxu0 %v3557_v18  ;;  %3394 = vmatpush1.bf16.msra.mxu1 %v3557_v18 }
 0x2fb   : > { %3295 = vmatprep.subr.bf16.mxu0 %v3852_v23  ;;  %1663 = vmatprep.subr.bf16.mxu1 %v3563_v19 }
 0x2fd   : > { %1535 = vmatmul.mubr.bf16.vlgmr.msra.gmra.mrb[0].mxu0 %v4313_v20  ;;  %1605 = vmatmul.mubr.bf16.vlgmr.msra.gmra.mrb[0].mxu1 %v4315_v21 }
 0x2fe   : > { %3296 = vmatpush3.bf16.msra.mxu0 %v3559_v22  ;;  %1544 = vmatprep.mubr.bf16.mxu0 %v3851_v4 }
 0x2ff   : > { %3297 = vmatprep.subr.bf16.mxu0 %v3852_v23  ;;  %1664 = vmatpush1.bf16.msra.mxu1 %v3561_v1 }
 0x300   : > { %1614 = vmatprep.mubr.bf16.mxu1 %v3851_v4  ;;  %1665 = vmatprep.subr.bf16.mxu1 %v3569_v24 }
 0x302   : > { %3298 = vmatpush3.bf16.msra.mxu0 %v3565_v25 }
 0x303   : > { %1666 = vmatpush1.bf16.msra.mxu1 %v3567_v27  ;;  %3299 = vmatprep.subr.bf16.mxu0 %v3852_v23 }
 0x304   : > { %1667 = vmatprep.subr.bf16.mxu1 %v3574_v28 }
 0x305   : > { %1545 = vmatmul.mubr.bf16.gmra.mrb[4].mxu0 %v4326_v26  ;;  %1615 = vmatmul.mubr.bf16.gmra.mrb[4].mxu1 %v4331_v29 }
 0x306   : > { %1554 = vmatprep.mubr.bf16.mxu0 %v3851_v4  ;;  %3300 = vmatpush3.bf16.msra.mxu0 %v3570_v30 }
 0x307   : > { %1624 = vmatprep.mubr.bf16.mxu1 %v3851_v4  ;;  %1668 = vmatpush1.bf16.msra.mxu1 %v3572_v31 }
 0x308   : > { %3301 = vmatprep.subr.bf16.mxu0 %v3852_v23  ;;  %1669 = vmatprep.subr.bf16.mxu1 %v3580_v32 }
 0x30a   : > { %3302 = vmatpush3.bf16.msra.mxu0 %v3576_v33 }
 0x30b   : > { %1670 = vmatpush1.bf16.msra.mxu1 %v3578_v34  ;;  %3303 = vmatprep.subr.bf16.mxu0 %v3852_v23 }
 0x30c   : > { %1671 = vmatprep.subr.bf16.mxu1 %v3585_v35 }
 0x30d   : > { %1555 = vmatmul.mubr.bf16.gmra.mrb[8].mxu0 %v4345_v36  ;;  %1625 = vmatmul.mubr.bf16.gmra.mrb[8].mxu1 %v4347_v37 }
 0x30e   : > { %1564 = vmatprep.mubr.bf16.mxu0 %v3851_v4  ;;  %1634 = vmatprep.mubr.bf16.mxu1 %v3851_v4 }
 0x30f   : > { %3304 = vmatpush3.bf16.msra.mxu0 %v3582_v38  ;;  %1672 = vmatpush1.bf16.msra.mxu1 %v3583_v39 }
 0x310   : > { %3305 = vmatprep.subr.bf16.mxu0 %v3852_v23  ;;  %1673 = vmatprep.subr.bf16.mxu1 %v3591_v40 }
 0x313   : > { %3306 = vmatpush3.bf16.msra.mxu0 %v3587_v41  ;;  %1674 = vmatpush1.bf16.msra.mxu1 %v3589_v42 }
 0x314   : > { %3307 = vmatprep.subr.bf16.mxu0 %v3852_v23  ;;  %1675 = vmatprep.subr.bf16.mxu1 %v3595_v43 }
 0x315   : > { %1565 = vmatmul.mubr.bf16.gmra.mrb[12].mxu0 %v3577_v44  ;;  %1635 = vmatmul.mubr.bf16.gmra.mrb[12].mxu1 %v4361_v45 }
 0x316   : > { %1574 = vmatprep.mubr.bf16.mxu0 %v3851_v4  ;;  %1644 = vmatprep.mubr.bf16.mxu1 %v3851_v4 }
 0x317   : > { %3308 = vmatpush3.bf16.msra.mxu0 %v3596_v47  ;;  %1676 = vmatpush1.bf16.msra.mxu1 %v3593_v46 }
 0x318   : > { %1677 = vmatprep.subr.bf16.mxu1 %v3601_v48  ;;  %3309 = vmatprep.subr.bf16.mxu0 %v3852_v23 }
 0x31b   : > { %1678 = vmatpush1.bf16.msra.mxu1 %v3599_v49  ;;  %3310 = vmatpush3.bf16.msra.mxu0 %v3602_v50 }
 0x31d   : > { %1575 = vmatmul.mubr.bf16.gmra.mrb[16].mxu0 %v3586_v51  ;;  %1645 = vmatmul.mubr.bf16.gmra.mrb[16].mxu1 %v3588_v52 }
 0x31e   : > { %1584 = vmatprep.mubr.bf16.mxu0 %v3851_v4  ;;  %1654 = vmatprep.mubr.bf16.mxu1 %v3851_v4 }
 0x325   : > { %1585 = vmatmul.mubr.bf16.gmra.mrb[20].mxu0 %v3592_v53  ;;  %1655 = vmatmul.mubr.bf16.gmra.mrb[20].mxu1 %v3597_v54 }
 0x326   : > { %1594 = vmatprep.mubr.bf16.mxu0 %v3851_v4  ;;  %1695 = vmatprep.mubr.bf16.mxu1 %v3851_v4 }
 0x32d   : > { %1595 = vmatmul.mubr.bf16.gmra.mrb[24].mxu0 %v3598_v55  ;;  %1696 = vmatmul.mubr.bf16.vlgmr.msra.gmra.mrb[24].mxu1 %v4313_v20 }
 0x32e   : > { %3311 = vmatprep.mubr.msk.bf16.mxu0 %vm3853_vm0, %v3852_v23  ;;  %1705 = vmatprep.mubr.bf16.mxu1 %v3851_v4 }
 0x335   : > { %3312 = vmatmul.mubr.bf16.vlgmr.msra.gmra.mrb[28].mxu0 %v4313_v20  ;;  %1706 = vmatmul.mubr.bf16.gmra.mrb[28].mxu1 %v4326_v26 }
 0x336   : > { %3315 = vmatprep.mubr.msk.bf16.mxu0 %vm3853_vm0, %v3852_v23  ;;  %1715 = vmatprep.mubr.bf16.mxu1 %v3851_v4 }
 0x33d   : > { %3316 = vmatmul.mubr.bf16.gmra.mrb[32].mxu0 %v4326_v26  ;;  %1716 = vmatmul.mubr.bf16.gmra.mrb[32].mxu1 %v4345_v36 }
 0x33e   : > { %3319 = vmatprep.mubr.msk.bf16.mxu0 %vm3853_vm0, %v3852_v23  ;;  %1725 = vmatprep.mubr.bf16.mxu1 %v3851_v4 }
 0x345   : > { %3320 = vmatmul.mubr.bf16.gmra.mrb[36].mxu0 %v4345_v36  ;;  %1726 = vmatmul.mubr.bf16.gmra.mrb[36].mxu1 %v3577_v44 }
 0x346   : > { %3323 = vmatprep.mubr.msk.bf16.mxu0 %vm3853_vm0, %v3852_v23  ;;  %1735 = vmatprep.mubr.bf16.mxu1 %v3851_v4 }
 0x34d   : > { %3324 = vmatmul.mubr.bf16.gmra.mrb[40].mxu0 %v3577_v44  ;;  %1736 = vmatmul.mubr.bf16.gmra.mrb[40].mxu1 %v3586_v51 }
 0x34e   : > { %3327 = vmatprep.mubr.msk.bf16.mxu0 %vm3853_vm0, %v3852_v23  ;;  %1745 = vmatprep.mubr.bf16.mxu1 %v3851_v4 }
 0x355   : > { %3328 = vmatmul.mubr.bf16.gmra.mrb[44].mxu0 %v3586_v51  ;;  %1746 = vmatmul.mubr.bf16.gmra.mrb[44].mxu1 %v3592_v53 }
 0x356   : > { %3331 = vmatprep.mubr.msk.bf16.mxu0 %vm3853_vm0, %v3852_v23  ;;  %1755 = vmatprep.mubr.bf16.mxu1 %v3851_v4 }
 0x35d   : > { %3332 = vmatmul.mubr.bf16.gmra.mrb[48].mxu0 %v3592_v53  ;;  %1756 = vmatmul.mubr.bf16.gmra.mrb[48].mxu1 %v3598_v55 }
 0x35e   : > { %3335 = vmatprep.mubr.msk.bf16.mxu0 %vm3853_vm0, %v3852_v23  ;;  %1765 = vmatprep.mubr.bf16.mxu1 %v3851_v4 }
 0x365   : > { %3336 = vmatmul.mubr.bf16.gmra.mrb[52].mxu0 %v3598_v55  ;;  %1766 = vmatmul.mubr.bf16.gmra.mrb[52].mxu1 %v4315_v21 }
 0x366   : > { %3339 = vmatprep.mubr.msk.bf16.mxu0 %vm3853_vm0, %v3852_v23  ;;  %1775 = vmatprep.mubr.bf16.mxu1 %v3851_v4 }
 0x36d   : > { %3340 = vmatmul.mubr.bf16.gmra.mrb[56].mxu0 %v4315_v21  ;;  %1776 = vmatmul.mubr.bf16.gmra.mrb[56].mxu1 %v4331_v29 }
 0x36e   : > { %3343 = vmatprep.mubr.msk.bf16.mxu0 %vm3853_vm0, %v3852_v23  ;;  %1785 = vmatprep.mubr.bf16.mxu1 %v3851_v4 }
 0x375   : > { %3344 = vmatmul.mubr.bf16.gmra.mrb[60].mxu0 %v4331_v29  ;;  %1786 = vmatmul.mubr.bf16.gmra.mrb[60].mxu1 %v4347_v37 }
 0x376   : > { %3347 = vmatprep.mubr.msk.bf16.mxu0 %vm3853_vm0, %v3852_v23  ;;  %1795 = vmatprep.mubr.bf16.mxu1 %v3851_v4 }
 0x37d   : > { %3348 = vmatmul.mubr.bf16.gmra.mrb[64].mxu0 %v4347_v37  ;;  %1796 = vmatmul.mubr.bf16.gmra.mrb[64].mxu1 %v4361_v45 }
 0x37e   : > { %3351 = vmatprep.mubr.msk.bf16.mxu0 %vm3853_vm0, %v3852_v23  ;;  %1805 = vmatprep.mubr.bf16.mxu1 %v3851_v4 }
 0x385   : > { %3352 = vmatmul.mubr.bf16.gmra.mrb[68].mxu0 %v4361_v45  ;;  %1806 = vmatmul.mubr.bf16.gmra.mrb[68].mxu1 %v3588_v52 }
 0x386   : > { %3355 = vmatprep.mubr.msk.bf16.mxu0 %vm3853_vm0, %v3852_v23  ;;  %1815 = vmatprep.mubr.bf16.mxu1 %v3851_v4 }
 0x38d   : > { %3356 = vmatmul.mubr.bf16.gmra.mrb[72].mxu0 %v3588_v52  ;;  %1816 = vmatmul.mubr.bf16.gmra.mrb[72].mxu1 %v3597_v54 }
 0x38e   : > { %3359 = vmatprep.mubr.msk.bf16.mxu0 %vm3853_vm0, %v3852_v23 }
 0x395   : > { %3360 = vmatmul.mubr.bf16.gmra.mrb[76].mxu0 %v3597_v54 }
 0x3d0   : > { %v1536_v63 = vpop.f32.mrb[0].mxu0  ;;  %v1606_v0 = vpop.f32.mrb[0].mxu1 }
 0x3d1   : > { %v1537_v2 = vadd.f32 %v1536_v63, %v4437_v61  ;;  %v1538_v3 = vpop.f32.mrb[1].mxu0  ;;  %v1607_v4 = vadd.f32 %v1606_v0, %v4437_v61  ;;  %v1608_v13 = vpop.f32.mrb[1].mxu1 }
 0x3d2   : > { %v1539_v5 = vadd.f32 %v1538_v3, %v4440_v62  ;;  %v1540_v6 = vpop.f32.mrb[2].mxu0  ;;  %v1609_v7 = vadd.f32 %v1608_v13, %v4440_v62  ;;  %v1610_v8 = vpop.f32.mrb[2].mxu1 }
 0x3d3   : > { %v1960_v9 = vmax.f32 %v1537_v2, 0.0  ;;  %v1541_v10 = vadd.f32 %v1540_v6, %v4437_v61  ;;  %v1542_v11 = vpop.f32.mrb[3].mxu0  ;;  %v2030_v12 = vmax.f32 %v1607_v4, 0.0  ;;  %v1611_v14 = vadd.f32 %v1610_v8, %v4437_v61  ;;  %v1612_v15 = vpop.f32.mrb[3].mxu1 }
 0x3d4   : > { %v1961_v16 = vmax.f32 %v1539_v5, 0.0  ;;  %v1543_v17 = vadd.f32 %v1542_v11, %v4440_v62  ;;  %v2031_v18 = vmax.f32 %v1609_v7, 0.0  ;;  %v1613_v19 = vadd.f32 %v1612_v15, %v4440_v62 }
 0x3d5   : > { %v1965_v20 = vmax.f32 %v1541_v10, 0.0  ;;  %v2035_v21 = vmax.f32 %v1611_v14, 0.0 }
 0x3d6   : > { %v2967_v22 = vpack.c.bf16 %v1961_v16, %v1960_v9  ;;  %v1966_v23 = vmax.f32 %v1543_v17, 0.0  ;;  %v3009_v1 = vpack.c.bf16 %v2031_v18, %v2030_v12  ;;  %v2036_v24 = vmax.f32 %v1613_v19, 0.0 }
 0x3d8   : > { %2490 = vst [vmem:[%s4142_s30] sm:$0xff] %v2967_v22  ;;  %v2970_v25 = vpack.c.bf16 %v1966_v23, %v1965_v20  ;;  %2532 = vst [vmem:[%s4142_s30 + $0x118] sm:$0xff] %v3009_v1  ;;  %v1546_v26 = vpop.f32.mrb[4].mxu0  ;;  %v3012_v27 = vpack.c.bf16 %v2036_v24, %v2035_v21  ;;  %v1616_v28 = vpop.f32.mrb[4].mxu1 }
 0x3d9   : > { %v1547_v29 = vadd.f32 %v1546_v26, %v4437_v61  ;;  %v1548_v30 = vpop.f32.mrb[5].mxu0  ;;  %v1617_v31 = vadd.f32 %v1616_v28, %v4437_v61  ;;  %v1618_v32 = vpop.f32.mrb[5].mxu1 }
 0x3da   : > { %2493 = vst [vmem:[%s4142_s30 + $0x14] sm:$0xff] %v2970_v25  ;;  %2535 = vst [vmem:[%s4142_s30 + $0x12c] sm:$0xff] %v3012_v27  ;;  %v1549_v33 = vadd.f32 %v1548_v30, %v4440_v62  ;;  %v1550_v34 = vpop.f32.mrb[6].mxu0  ;;  %v1619_v35 = vadd.f32 %v1618_v32, %v4440_v62  ;;  %v1620_v36 = vpop.f32.mrb[6].mxu1 }
 0x3db   : > { %v1970_v37 = vmax.f32 %v1547_v29, 0.0  ;;  %v1551_v38 = vadd.f32 %v1550_v34, %v4437_v61  ;;  %v1552_v39 = vpop.f32.mrb[7].mxu0  ;;  %v2040_v40 = vmax.f32 %v1617_v31, 0.0  ;;  %v1621_v41 = vadd.f32 %v1620_v36, %v4437_v61  ;;  %v1622_v42 = vpop.f32.mrb[7].mxu1 }
 0x3dc   : > { %v1971_v43 = vmax.f32 %v1549_v33, 0.0  ;;  %v1553_v44 = vadd.f32 %v1552_v39, %v4440_v62  ;;  %v2041_v45 = vmax.f32 %v1619_v35, 0.0  ;;  %v1623_v46 = vadd.f32 %v1622_v42, %v4440_v62 }
 0x3dd   : > { %v1975_v47 = vmax.f32 %v1551_v38, 0.0  ;;  %v2045_v48 = vmax.f32 %v1621_v41, 0.0 }
 0x3de   : > { %v2973_v49 = vpack.c.bf16 %v1971_v43, %v1970_v37  ;;  %v1976_v50 = vmax.f32 %v1553_v44, 0.0  ;;  %v3015_v51 = vpack.c.bf16 %v2041_v45, %v2040_v40  ;;  %v2046_v52 = vmax.f32 %v1623_v46, 0.0 }
 0x3e0   : > { %2496 = vst [vmem:[%s4142_s30 + $0x28] sm:$0xff] %v2973_v49  ;;  %v2976_v53 = vpack.c.bf16 %v1976_v50, %v1975_v47  ;;  %2538 = vst [vmem:[%s4142_s30 + $0x140] sm:$0xff] %v3015_v51  ;;  %v1556_v54 = vpop.f32.mrb[8].mxu0  ;;  %v3018_v55 = vpack.c.bf16 %v2046_v52, %v2045_v48  ;;  %v1626_v56 = vpop.f32.mrb[8].mxu1 }
 0x3e1   : > { %v1557_v58 = vadd.f32 %v1556_v54, %v4437_v61  ;;  %v1558_v60 = vpop.f32.mrb[9].mxu0  ;;  %v1627_v63 = vadd.f32 %v1626_v56, %v4437_v61  ;;  %v1628_v0 = vpop.f32.mrb[9].mxu1 }
 0x3e2   : > { %2499 = vst [vmem:[%s4142_s30 + $0x3c] sm:$0xff] %v2976_v53  ;;  %2541 = vst [vmem:[%s4142_s30 + $0x154] sm:$0xff] %v3018_v55  ;;  %v1559_v2 = vadd.f32 %v1558_v60, %v4440_v62  ;;  %v1560_v3 = vpop.f32.mrb[10].mxu0  ;;  %v1629_v4 = vadd.f32 %v1628_v0, %v4440_v62  ;;  %v1630_v13 = vpop.f32.mrb[10].mxu1 }
 0x3e3   : > { %v1980_v5 = vmax.f32 %v1557_v58, 0.0  ;;  %v1561_v6 = vadd.f32 %v1560_v3, %v4437_v61  ;;  %v1562_v7 = vpop.f32.mrb[11].mxu0  ;;  %v2050_v8 = vmax.f32 %v1627_v63, 0.0  ;;  %v1631_v9 = vadd.f32 %v1630_v13, %v4437_v61  ;;  %v1632_v10 = vpop.f32.mrb[11].mxu1 }
 0x3e4   : > { %v1981_v11 = vmax.f32 %v1559_v2, 0.0  ;;  %v1563_v12 = vadd.f32 %v1562_v7, %v4440_v62  ;;  %v2051_v14 = vmax.f32 %v1629_v4, 0.0  ;;  %v1633_v15 = vadd.f32 %v1632_v10, %v4440_v62 }
 0x3e5   : > { %v1985_v16 = vmax.f32 %v1561_v6, 0.0  ;;  %v2055_v17 = vmax.f32 %v1631_v9, 0.0 }
 0x3e6   : > { %v2979_v18 = vpack.c.bf16 %v1981_v11, %v1980_v5  ;;  %v1986_v19 = vmax.f32 %v1563_v12, 0.0  ;;  %v3021_v20 = vpack.c.bf16 %v2051_v14, %v2050_v8  ;;  %v2056_v21 = vmax.f32 %v1633_v15, 0.0 }
 0x3e8   : > { %2502 = vst [vmem:[%s4142_s30 + $0x50] sm:$0xff] %v2979_v18  ;;  %v2982_v22 = vpack.c.bf16 %v1986_v19, %v1985_v16  ;;  %2544 = vst [vmem:[%s4142_s30 + $0x168] sm:$0xff] %v3021_v20  ;;  %v1566_v23 = vpop.f32.mrb[12].mxu0  ;;  %v3024_v1 = vpack.c.bf16 %v2056_v21, %v2055_v17  ;;  %v1636_v24 = vpop.f32.mrb[12].mxu1 }
 0x3e9   : > { %v1567_v25 = vadd.f32 %v1566_v23, %v4437_v61  ;;  %v1568_v26 = vpop.f32.mrb[13].mxu0  ;;  %v1637_v27 = vadd.f32 %v1636_v24, %v4437_v61  ;;  %v1638_v28 = vpop.f32.mrb[13].mxu1 }
 0x3ea   : > { %2505 = vst [vmem:[%s4142_s30 + $0x64] sm:$0xff] %v2982_v22  ;;  %2547 = vst [vmem:[%s4142_s30 + $0x17c] sm:$0xff] %v3024_v1  ;;  %v1569_v29 = vadd.f32 %v1568_v26, %v4440_v62  ;;  %v1570_v30 = vpop.f32.mrb[14].mxu0  ;;  %v1639_v31 = vadd.f32 %v1638_v28, %v4440_v62  ;;  %v1640_v32 = vpop.f32.mrb[14].mxu1 }
 0x3eb   : > { %v1990_v33 = vmax.f32 %v1567_v25, 0.0  ;;  %v1571_v34 = vadd.f32 %v1570_v30, %v4437_v61  ;;  %v1572_v35 = vpop.f32.mrb[15].mxu0  ;;  %v2060_v36 = vmax.f32 %v1637_v27, 0.0  ;;  %v1641_v37 = vadd.f32 %v1640_v32, %v4437_v61  ;;  %v1642_v38 = vpop.f32.mrb[15].mxu1 }
 0x3ec   : > { %v1991_v39 = vmax.f32 %v1569_v29, 0.0  ;;  %v1573_v40 = vadd.f32 %v1572_v35, %v4440_v62  ;;  %v2061_v41 = vmax.f32 %v1639_v31, 0.0  ;;  %v1643_v42 = vadd.f32 %v1642_v38, %v4440_v62 }
 0x3ed   : > { %v1995_v43 = vmax.f32 %v1571_v34, 0.0  ;;  %v2065_v44 = vmax.f32 %v1641_v37, 0.0  ;;  %v1203_v25 = vsub.s32 2, %v4429_v57  ;;  %v1207_v30 = vsub.s32 3, %v4429_v57 }
 0x3ee   : > { %v2985_v45 = vpack.c.bf16 %v1991_v39, %v1990_v33  ;;  %v1996_v46 = vmax.f32 %v1573_v40, 0.0  ;;  %v3027_v47 = vpack.c.bf16 %v2061_v41, %v2060_v36  ;;  %v2066_v48 = vmax.f32 %v1643_v42, 0.0 }
 0x3ef   : > { %v4511_v40 = vrot.slane %v4433_v59, %v1203_v25 }
 0x3f0   : > { %2508 = vst [vmem:[%s4142_s30 + $0x78] sm:$0xff] %v2985_v45  ;;  %v2988_v49 = vpack.c.bf16 %v1996_v46, %v1995_v43  ;;  %2550 = vst [vmem:[%s4142_s30 + $0x190] sm:$0xff] %v3027_v47  ;;  %v1576_v50 = vpop.f32.mrb[16].mxu0  ;;  %v3030_v51 = vpack.c.bf16 %v2066_v48, %v2065_v44  ;;  %v1646_v52 = vpop.f32.mrb[16].mxu1  ;;  %v4514_v44 = vrot.slane %v4433_v59, %v1207_v30 }
 0x3f1   : > { %v1577_v53 = vadd.f32 %v1576_v50, %v4437_v61  ;;  %v1578_v54 = vpop.f32.mrb[17].mxu0  ;;  %v1647_v55 = vadd.f32 %v1646_v52, %v4437_v61  ;;  %v1648_v56 = vpop.f32.mrb[17].mxu1  ;;  %v1211_v52 = vsub.s32 4, %v4429_v57 }
 0x3f2   : > { %2511 = vst [vmem:[%s4142_s30 + $0x8c] sm:$0xff] %v2988_v49  ;;  %2553 = vst [vmem:[%s4142_s30 + $0x1a4] sm:$0xff] %v3030_v51  ;;  %v1579_v58 = vadd.f32 %v1578_v54, %v4440_v62  ;;  %v1580_v60 = vpop.f32.mrb[18].mxu0  ;;  %v1649_v63 = vadd.f32 %v1648_v56, %v4440_v62  ;;  %v1650_v0 = vpop.f32.mrb[18].mxu1 }
 0x3f3   : > { %v2000_v2 = vmax.f32 %v1577_v53, 0.0  ;;  %v1581_v3 = vadd.f32 %v1580_v60, %v4437_v61  ;;  %v1582_v4 = vpop.f32.mrb[19].mxu0  ;;  %v2070_v13 = vmax.f32 %v1647_v55, 0.0  ;;  %v1651_v5 = vadd.f32 %v1650_v0, %v4437_v61  ;;  %v1652_v6 = vpop.f32.mrb[19].mxu1 }
 0x3f4   : > { %v2001_v7 = vmax.f32 %v1579_v58, 0.0  ;;  %v1583_v8 = vadd.f32 %v1582_v4, %v4440_v62  ;;  %v2071_v9 = vmax.f32 %v1649_v63, 0.0  ;;  %v1653_v10 = vadd.f32 %v1652_v6, %v4440_v62 }
 0x3f5   : > { %v2005_v11 = vmax.f32 %v1581_v3, 0.0  ;;  %v2075_v12 = vmax.f32 %v1651_v5, 0.0 }
 0x3f6   : > { %v2991_v14 = vpack.c.bf16 %v2001_v7, %v2000_v2  ;;  %v2006_v15 = vmax.f32 %v1583_v8, 0.0  ;;  %v3033_v16 = vpack.c.bf16 %v2071_v9, %v2070_v13  ;;  %v2076_v17 = vmax.f32 %v1653_v10, 0.0 }
 0x3f7   : > { %v4529_v8 = vrot.slane %v4433_v59, %v1211_v52 }
 0x3f8   : > { %2514 = vst [vmem:[%s4142_s30 + $0xa0] sm:$0xff] %v2991_v14  ;;  %v2994_v18 = vpack.c.bf16 %v2006_v15, %v2005_v11  ;;  %2556 = vst [vmem:[%s4142_s30 + $0x1b8] sm:$0xff] %v3033_v16  ;;  %v1586_v19 = vpop.f32.mrb[20].mxu0  ;;  %v3036_v20 = vpack.c.bf16 %v2076_v17, %v2075_v12  ;;  %v1656_v21 = vpop.f32.mrb[20].mxu1 }
 0x3f9   : > { %v1587_v22 = vadd.f32 %v1586_v19, %v4437_v61  ;;  %v1588_v23 = vpop.f32.mrb[21].mxu0  ;;  %v1657_v1 = vadd.f32 %v1656_v21, %v4437_v61  ;;  %v1658_v24 = vpop.f32.mrb[21].mxu1 }
 0x3fa   : > { %2517 = vst [vmem:[%s4142_s30 + $0xb4] sm:$0xff] %v2994_v18  ;;  %2559 = vst [vmem:[%s4142_s30 + $0x1cc] sm:$0xff] %v3036_v20  ;;  %v1589_v26 = vadd.f32 %v1588_v23, %v4440_v62  ;;  %v1590_v27 = vpop.f32.mrb[22].mxu0  ;;  %v1659_v28 = vadd.f32 %v1658_v24, %v4440_v62  ;;  %v1660_v29 = vpop.f32.mrb[22].mxu1 }
 0x3fb   : > { %v2010_v31 = vmax.f32 %v1587_v22, 0.0  ;;  %v1591_v32 = vadd.f32 %v1590_v27, %v4437_v61  ;;  %v1592_v33 = vpop.f32.mrb[23].mxu0  ;;  %v2080_v34 = vmax.f32 %v1657_v1, 0.0  ;;  %v1661_v35 = vpop.f32.mrb[23].mxu1 }
 0x3fc   : > { %v2011_v36 = vmax.f32 %v1589_v26, 0.0  ;;  %v1593_v37 = vadd.f32 %v1592_v33, %v4440_v62  ;;  %v2081_v38 = vmax.f32 %v1659_v28, 0.0 }
 0x3fd   : > { %v2015_v39 = vmax.f32 %v1591_v32, 0.0 }
 0x3fe   : > { %v2997_v41 = vpack.c.bf16 %v2011_v36, %v2010_v31  ;;  %v2016_v42 = vmax.f32 %v1593_v37, 0.0  ;;  %v3039_v43 = vpack.c.bf16 %v2081_v38, %v2080_v34 }
 0x400   : > { %2520 = vst [vmem:[%s4142_s30 + $0xc8] sm:$0xff] %v2997_v41  ;;  %v3000_v45 = vpack.c.bf16 %v2016_v42, %v2015_v39  ;;  %2562 = vst [vmem:[%s4142_s30 + $0x1e0] sm:$0xff] %v3039_v43  ;;  %v1596_v46 = vpop.f32.mrb[24].mxu0  ;;  %v1697_v47 = vpop.f32.mrb[24].mxu1 }
 0x401   : > { %v1597_v48 = vadd.f32 %v1596_v46, %v4437_v61  ;;  %v1598_v49 = vpop.f32.mrb[25].mxu0  ;;  %v1698_v50 = vadd.f32 %v1697_v47, %v4511_v40  ;;  %v1699_v51 = vpop.f32.mrb[25].mxu1 }
 0x402   : > { %2523 = vst [vmem:[%s4142_s30 + $0xdc] sm:$0xff] %v3000_v45  ;;  %v1599_v53 = vadd.f32 %v1598_v49, %v4440_v62  ;;  %v1600_v54 = vpop.f32.mrb[26].mxu0  ;;  %v1700_v55 = vadd.f32 %v1699_v51, %v4514_v44  ;;  %v1701_v56 = vpop.f32.mrb[26].mxu1 }
 0x403   : > { %v2020_v58 = vmax.f32 %v1597_v48, 0.0  ;;  %v1601_v60 = vadd.f32 %v1600_v54, %v4437_v61  ;;  %v1602_v63 = vpop.f32.mrb[27].mxu0  ;;  %v1962_v0 = vmax.f32 %v1698_v50, 0.0  ;;  %v1702_v2 = vadd.f32 %v1701_v56, %v4511_v40  ;;  %v1703_v3 = vpop.f32.mrb[27].mxu1 }
 0x404   : > { %v2021_v4 = vmax.f32 %v1599_v53, 0.0  ;;  %v1603_v57 = vadd.f32 %v1602_v63, %v4440_v62  ;;  %v1963_v13 = vmax.f32 %v1700_v55, 0.0  ;;  %v1704_v5 = vadd.f32 %v1703_v3, %v4514_v44 }
 0x405   : > { %v2025_v6 = vmax.f32 %v1601_v60, 0.0  ;;  %v1967_v7 = vmax.f32 %v1702_v2, 0.0 }
 0x406   : > { %v3003_v61 = vpack.c.bf16 %v2021_v4, %v2020_v58  ;;  %v2026_v9 = vmax.f32 %v1603_v57, 0.0  ;;  %v2968_v10 = vpack.c.bf16 %v1963_v13, %v1962_v0  ;;  %v1968_v11 = vmax.f32 %v1704_v5, 0.0 }
 0x408   : > { %2526 = vst [vmem:[%s4142_s30 + $0xf0] sm:$0xff] %v3003_v61  ;;  %v3006_v12 = vpack.c.bf16 %v2026_v9, %v2025_v6  ;;  %2491 = vst [vmem:[%s4142_s30 + $0x8] sm:$0xff] %v2968_v10  ;;  %v2971_v14 = vpack.c.bf16 %v1968_v11, %v1967_v7  ;;  %v1858_v15 = vpop.f32.mrb[28].mxu0  ;;  %v1707_v62 = vpop.f32.mrb[28].mxu1 }
 0x409   : > { %v1859_v16 = vadd.f32 %v1858_v15, %v4529_v8  ;;  %v3313_v17 = vpop.f32.mrb[29].mxu0  ;;  %v1708_v18 = vadd.f32 %v1707_v62, %v4511_v40  ;;  %v1709_v19 = vpop.f32.mrb[29].mxu1 }
 0x40a   : > { %2529 = vst [vmem:[%s4142_s30 + $0x104] sm:$0xff] %v3006_v12  ;;  %2494 = vst [vmem:[%s4142_s30 + $0x1c] sm:$0xff] %v2971_v14  ;;  %v1861_v59 = vpop.f32.mrb[30].mxu0  ;;  %v1710_v20 = vadd.f32 %v1709_v19, %v4514_v44  ;;  %v1711_v21 = vpop.f32.mrb[30].mxu1 }
 0x40b   : > { %v1964_v22 = vmax.f32 %v1859_v16, 0.0  ;;  %v1862_v23 = vadd.f32 %v1861_v59, %v4529_v8  ;;  %v3314_v1 = vpop.f32.mrb[31].mxu0  ;;  %v1972_v24 = vmax.f32 %v1708_v18, 0.0  ;;  %v1712_v25 = vadd.f32 %v1711_v21, %v4511_v40  ;;  %v1713_v26 = vpop.f32.mrb[31].mxu1 }
 0x40c   : > { %v1973_v27 = vmax.f32 %v1710_v20, 0.0  ;;  %v1714_v28 = vadd.f32 %v1713_v26, %v4514_v44 }
 0x40d   : > { %v2969_v29 = vpack.c.bf16 %v1964_v22, %v1964_v22  ;;  %v1969_v30 = vmax.f32 %v1862_v23, 0.0  ;;  %v1977_v31 = vmax.f32 %v1712_v25, 0.0 }
 0x40e   : > { %v2974_v32 = vpack.c.bf16 %v1973_v27, %v1972_v24  ;;  %v1978_v33 = vmax.f32 %v1714_v28, 0.0 }
 0x40f   : > { %2492 = vst [vmem:[%s4142_s30 + $0x10] sm:$0xf] %v2969_v29  ;;  %v2972_v34 = vpack.c.bf16 %v1969_v30, %v1969_v30 }
 0x410   : > { %2497 = vst [vmem:[%s4142_s30 + $0x30] sm:$0xff] %v2974_v32  ;;  %v2977_v35 = vpack.c.bf16 %v1978_v33, %v1977_v31  ;;  %v1866_v36 = vpop.f32.mrb[32].mxu0  ;;  %v1717_v37 = vpop.f32.mrb[32].mxu1 }
 0x411   : > { %2495 = vst [vmem:[%s4142_s30 + $0x24] sm:$0xf] %v2972_v34  ;;  %v1867_v38 = vadd.f32 %v1866_v36, %v4529_v8  ;;  %v3317_v39 = vpop.f32.mrb[33].mxu0  ;;  %v1718_v41 = vadd.f32 %v1717_v37, %v4511_v40  ;;  %v1719_v42 = vpop.f32.mrb[33].mxu1 }
 0x412   : > { %2500 = vst [vmem:[%s4142_s30 + $0x44] sm:$0xff] %v2977_v35  ;;  %v1869_v43 = vpop.f32.mrb[34].mxu0  ;;  %v1720_v45 = vadd.f32 %v1719_v42, %v4514_v44  ;;  %v1721_v46 = vpop.f32.mrb[34].mxu1 }
 0x413   : > { %v1974_v47 = vmax.f32 %v1867_v38, 0.0  ;;  %v1870_v48 = vadd.f32 %v1869_v43, %v4529_v8  ;;  %v3318_v49 = vpop.f32.mrb[35].mxu0  ;;  %v1982_v50 = vmax.f32 %v1718_v41, 0.0  ;;  %v1722_v51 = vadd.f32 %v1721_v46, %v4511_v40  ;;  %v1723_v52 = vpop.f32.mrb[35].mxu1 }
 0x414   : > { %v1983_v53 = vmax.f32 %v1720_v45, 0.0  ;;  %v1724_v54 = vadd.f32 %v1723_v52, %v4514_v44 }
 0x415   : > { %v2975_v55 = vpack.c.bf16 %v1974_v47, %v1974_v47  ;;  %v1979_v56 = vmax.f32 %v1870_v48, 0.0  ;;  %v1987_v58 = vmax.f32 %v1722_v51, 0.0 }
 0x416   : > { %v2980_v60 = vpack.c.bf16 %v1983_v53, %v1982_v50  ;;  %v1988_v63 = vmax.f32 %v1724_v54, 0.0 }
 0x417   : > { %2498 = vst [vmem:[%s4142_s30 + $0x38] sm:$0xf] %v2975_v55  ;;  %v2978_v0 = vpack.c.bf16 %v1979_v56, %v1979_v56 }
 0x418   : > { %2503 = vst [vmem:[%s4142_s30 + $0x58] sm:$0xff] %v2980_v60  ;;  %v2983_v2 = vpack.c.bf16 %v1988_v63, %v1987_v58  ;;  %v1874_v3 = vpop.f32.mrb[36].mxu0  ;;  %v1727_v4 = vpop.f32.mrb[36].mxu1 }
 0x419   : > { %2501 = vst [vmem:[%s4142_s30 + $0x4c] sm:$0xf] %v2978_v0  ;;  %v1875_v57 = vadd.f32 %v1874_v3, %v4529_v8  ;;  %v3321_v13 = vpop.f32.mrb[37].mxu0  ;;  %v1728_v5 = vadd.f32 %v1727_v4, %v4511_v40  ;;  %v1729_v6 = vpop.f32.mrb[37].mxu1 }
 0x41a   : > { %2506 = vst [vmem:[%s4142_s30 + $0x6c] sm:$0xff] %v2983_v2  ;;  %v1877_v7 = vpop.f32.mrb[38].mxu0  ;;  %v1730_v61 = vadd.f32 %v1729_v6, %v4514_v44  ;;  %v1731_v9 = vpop.f32.mrb[38].mxu1 }
 0x41b   : > { %v1984_v10 = vmax.f32 %v1875_v57, 0.0  ;;  %v1878_v11 = vadd.f32 %v1877_v7, %v4529_v8  ;;  %v3322_v12 = vpop.f32.mrb[39].mxu0  ;;  %v1992_v14 = vmax.f32 %v1728_v5, 0.0  ;;  %v1732_v15 = vadd.f32 %v1731_v9, %v4511_v40  ;;  %v1733_v62 = vpop.f32.mrb[39].mxu1 }
 0x41c   : > { %v1993_v16 = vmax.f32 %v1730_v61, 0.0  ;;  %v1734_v17 = vadd.f32 %v1733_v62, %v4514_v44 }
 0x41d   : > { %v2981_v18 = vpack.c.bf16 %v1984_v10, %v1984_v10  ;;  %v1989_v19 = vmax.f32 %v1878_v11, 0.0  ;;  %v1997_v59 = vmax.f32 %v1732_v15, 0.0 }
 0x41e   : > { %v2986_v20 = vpack.c.bf16 %v1993_v16, %v1992_v14  ;;  %v1998_v21 = vmax.f32 %v1734_v17, 0.0 }
 0x41f   : > { %2504 = vst [vmem:[%s4142_s30 + $0x60] sm:$0xf] %v2981_v18  ;;  %v2984_v22 = vpack.c.bf16 %v1989_v19, %v1989_v19 }
 0x420   : > { %2509 = vst [vmem:[%s4142_s30 + $0x80] sm:$0xff] %v2986_v20  ;;  %v2989_v23 = vpack.c.bf16 %v1998_v21, %v1997_v59  ;;  %v1882_v1 = vpop.f32.mrb[40].mxu0  ;;  %v1737_v24 = vpop.f32.mrb[40].mxu1 }
 0x421   : > { %2507 = vst [vmem:[%s4142_s30 + $0x74] sm:$0xf] %v2984_v22  ;;  %v1883_v25 = vadd.f32 %v1882_v1, %v4529_v8  ;;  %v3325_v26 = vpop.f32.mrb[41].mxu0  ;;  %v1738_v27 = vadd.f32 %v1737_v24, %v4511_v40  ;;  %v1739_v28 = vpop.f32.mrb[41].mxu1 }
 0x422   : > { %2512 = vst [vmem:[%s4142_s30 + $0x94] sm:$0xff] %v2989_v23  ;;  %v1885_v29 = vpop.f32.mrb[42].mxu0  ;;  %v1740_v30 = vadd.f32 %v1739_v28, %v4514_v44  ;;  %v1741_v31 = vpop.f32.mrb[42].mxu1 }
 0x423   : > { %v1994_v32 = vmax.f32 %v1883_v25, 0.0  ;;  %v1886_v33 = vadd.f32 %v1885_v29, %v4529_v8  ;;  %v3326_v34 = vpop.f32.mrb[43].mxu0  ;;  %v2002_v35 = vmax.f32 %v1738_v27, 0.0  ;;  %v1742_v36 = vadd.f32 %v1741_v31, %v4511_v40  ;;  %v1743_v37 = vpop.f32.mrb[43].mxu1 }
 0x424   : > { %v2003_v38 = vmax.f32 %v1740_v30, 0.0  ;;  %v1744_v39 = vadd.f32 %v1743_v37, %v4514_v44 }
 0x425   : > { %v2987_v41 = vpack.c.bf16 %v1994_v32, %v1994_v32  ;;  %v1999_v42 = vmax.f32 %v1886_v33, 0.0  ;;  %v2007_v43 = vmax.f32 %v1742_v36, 0.0 }
 0x426   : > { %v2992_v45 = vpack.c.bf16 %v2003_v38, %v2002_v35  ;;  %v2008_v46 = vmax.f32 %v1744_v39, 0.0 }
 0x427   : > { %2510 = vst [vmem:[%s4142_s30 + $0x88] sm:$0xf] %v2987_v41  ;;  %v2990_v47 = vpack.c.bf16 %v1999_v42, %v1999_v42 }
 0x428   : > { %2515 = vst [vmem:[%s4142_s30 + $0xa8] sm:$0xff] %v2992_v45  ;;  %v2995_v48 = vpack.c.bf16 %v2008_v46, %v2007_v43  ;;  %v1890_v49 = vpop.f32.mrb[44].mxu0  ;;  %v1747_v50 = vpop.f32.mrb[44].mxu1 }
 0x429   : > { %2513 = vst [vmem:[%s4142_s30 + $0x9c] sm:$0xf] %v2990_v47  ;;  %v1891_v51 = vadd.f32 %v1890_v49, %v4529_v8  ;;  %v3329_v52 = vpop.f32.mrb[45].mxu0  ;;  %v1748_v53 = vadd.f32 %v1747_v50, %v4511_v40  ;;  %v1749_v54 = vpop.f32.mrb[45].mxu1 }
 0x42a   : > { %2518 = vst [vmem:[%s4142_s30 + $0xbc] sm:$0xff] %v2995_v48  ;;  %v1893_v55 = vpop.f32.mrb[46].mxu0  ;;  %v1750_v56 = vadd.f32 %v1749_v54, %v4514_v44  ;;  %v1751_v58 = vpop.f32.mrb[46].mxu1 }
 0x42b   : > { %v2004_v60 = vmax.f32 %v1891_v51, 0.0  ;;  %v1894_v63 = vadd.f32 %v1893_v55, %v4529_v8  ;;  %v3330_v0 = vpop.f32.mrb[47].mxu0  ;;  %v2012_v2 = vmax.f32 %v1748_v53, 0.0  ;;  %v1752_v3 = vadd.f32 %v1751_v58, %v4511_v40  ;;  %v1753_v4 = vpop.f32.mrb[47].mxu1 }
 0x42c   : > { %v2013_v57 = vmax.f32 %v1750_v56, 0.0  ;;  %v1754_v13 = vadd.f32 %v1753_v4, %v4514_v44 }
 0x42d   : > { %v2993_v5 = vpack.c.bf16 %v2004_v60, %v2004_v60  ;;  %v2009_v6 = vmax.f32 %v1894_v63, 0.0  ;;  %v2017_v7 = vmax.f32 %v1752_v3, 0.0 }
 0x42e   : > { %v2998_v61 = vpack.c.bf16 %v2013_v57, %v2012_v2  ;;  %v2018_v9 = vmax.f32 %v1754_v13, 0.0 }
 0x42f   : > { %2516 = vst [vmem:[%s4142_s30 + $0xb0] sm:$0xf] %v2993_v5  ;;  %v2996_v10 = vpack.c.bf16 %v2009_v6, %v2009_v6 }
 0x430   : > { %2521 = vst [vmem:[%s4142_s30 + $0xd0] sm:$0xff] %v2998_v61  ;;  %v3001_v11 = vpack.c.bf16 %v2018_v9, %v2017_v7  ;;  %v1898_v12 = vpop.f32.mrb[48].mxu0  ;;  %v1757_v14 = vpop.f32.mrb[48].mxu1 }
 0x431   : > { %2519 = vst [vmem:[%s4142_s30 + $0xc4] sm:$0xf] %v2996_v10  ;;  %v1899_v15 = vadd.f32 %v1898_v12, %v4529_v8  ;;  %v3333_v62 = vpop.f32.mrb[49].mxu0  ;;  %v1758_v16 = vadd.f32 %v1757_v14, %v4511_v40  ;;  %v1759_v17 = vpop.f32.mrb[49].mxu1 }
 0x432   : > { %2524 = vst [vmem:[%s4142_s30 + $0xe4] sm:$0xff] %v3001_v11  ;;  %v1901_v18 = vpop.f32.mrb[50].mxu0  ;;  %v1760_v19 = vadd.f32 %v1759_v17, %v4514_v44  ;;  %v1761_v59 = vpop.f32.mrb[50].mxu1 }
 0x433   : > { %v2014_v20 = vmax.f32 %v1899_v15, 0.0  ;;  %v1902_v21 = vadd.f32 %v1901_v18, %v4529_v8  ;;  %v3334_v22 = vpop.f32.mrb[51].mxu0  ;;  %v2022_v23 = vmax.f32 %v1758_v16, 0.0  ;;  %v1762_v1 = vadd.f32 %v1761_v59, %v4511_v40  ;;  %v1763_v24 = vpop.f32.mrb[51].mxu1 }
 0x434   : > { %v2023_v25 = vmax.f32 %v1760_v19, 0.0  ;;  %v1764_v26 = vadd.f32 %v1763_v24, %v4514_v44 }
 0x435   : > { %v2999_v27 = vpack.c.bf16 %v2014_v20, %v2014_v20  ;;  %v2019_v28 = vmax.f32 %v1902_v21, 0.0  ;;  %v2027_v29 = vmax.f32 %v1762_v1, 0.0 }
 0x436   : > { %v3004_v30 = vpack.c.bf16 %v2023_v25, %v2022_v23  ;;  %v2028_v31 = vmax.f32 %v1764_v26, 0.0 }
 0x437   : > { %2522 = vst [vmem:[%s4142_s30 + $0xd8] sm:$0xf] %v2999_v27  ;;  %v3002_v32 = vpack.c.bf16 %v2019_v28, %v2019_v28 }
 0x438   : > { %2527 = vst [vmem:[%s4142_s30 + $0xf8] sm:$0xff] %v3004_v30  ;;  %v3007_v33 = vpack.c.bf16 %v2028_v31, %v2027_v29  ;;  %v1906_v34 = vpop.f32.mrb[52].mxu0  ;;  %v1767_v35 = vpop.f32.mrb[52].mxu1 }
 0x439   : > { %2525 = vst [vmem:[%s4142_s30 + $0xec] sm:$0xf] %v3002_v32  ;;  %v1907_v36 = vadd.f32 %v1906_v34, %v4529_v8  ;;  %v3337_v37 = vpop.f32.mrb[53].mxu0  ;;  %v1768_v38 = vadd.f32 %v1767_v35, %v4511_v40  ;;  %v1769_v39 = vpop.f32.mrb[53].mxu1 }
 0x43a   : > { %2530 = vst [vmem:[%s4142_s30 + $0x10c] sm:$0xff] %v3007_v33  ;;  %v1909_v41 = vpop.f32.mrb[54].mxu0  ;;  %v1770_v42 = vadd.f32 %v1769_v39, %v4514_v44  ;;  %v1771_v43 = vpop.f32.mrb[54].mxu1 }
 0x43b   : > { %v2024_v45 = vmax.f32 %v1907_v36, 0.0  ;;  %v1910_v46 = vadd.f32 %v1909_v41, %v4529_v8  ;;  %v3338_v47 = vpop.f32.mrb[55].mxu0  ;;  %v2032_v48 = vmax.f32 %v1768_v38, 0.0  ;;  %v1772_v49 = vadd.f32 %v1771_v43, %v4511_v40  ;;  %v1773_v50 = vpop.f32.mrb[55].mxu1 }
 0x43c   : > { %v2033_v51 = vmax.f32 %v1770_v42, 0.0  ;;  %v1774_v52 = vadd.f32 %v1773_v50, %v4514_v44 }
 0x43d   : > { %v3005_v53 = vpack.c.bf16 %v2024_v45, %v2024_v45  ;;  %v2029_v54 = vmax.f32 %v1910_v46, 0.0  ;;  %v2037_v55 = vmax.f32 %v1772_v49, 0.0 }
 0x43e   : > { %v3010_v56 = vpack.c.bf16 %v2033_v51, %v2032_v48  ;;  %v2038_v58 = vmax.f32 %v1774_v52, 0.0 }
 0x43f   : > { %2528 = vst [vmem:[%s4142_s30 + $0x100] sm:$0xf] %v3005_v53  ;;  %v3008_v60 = vpack.c.bf16 %v2029_v54, %v2029_v54 }
 0x440   : > { %2533 = vst [vmem:[%s4142_s30 + $0x120] sm:$0xff] %v3010_v56  ;;  %v3013_v63 = vpack.c.bf16 %v2038_v58, %v2037_v55  ;;  %v1914_v0 = vpop.f32.mrb[56].mxu0  ;;  %v1777_v2 = vpop.f32.mrb[56].mxu1 }
 0x441   : > { %2531 = vst [vmem:[%s4142_s30 + $0x114] sm:$0xf] %v3008_v60  ;;  %v1915_v3 = vadd.f32 %v1914_v0, %v4529_v8  ;;  %v3341_v4 = vpop.f32.mrb[57].mxu0  ;;  %v1778_v57 = vadd.f32 %v1777_v2, %v4511_v40  ;;  %v1779_v13 = vpop.f32.mrb[57].mxu1 }
 0x442   : > { %2536 = vst [vmem:[%s4142_s30 + $0x134] sm:$0xff] %v3013_v63  ;;  %v1917_v5 = vpop.f32.mrb[58].mxu0  ;;  %v1780_v6 = vadd.f32 %v1779_v13, %v4514_v44  ;;  %v1781_v7 = vpop.f32.mrb[58].mxu1 }
 0x443   : > { %v2034_v61 = vmax.f32 %v1915_v3, 0.0  ;;  %v1918_v9 = vadd.f32 %v1917_v5, %v4529_v8  ;;  %v3342_v10 = vpop.f32.mrb[59].mxu0  ;;  %v2042_v11 = vmax.f32 %v1778_v57, 0.0  ;;  %v1782_v12 = vadd.f32 %v1781_v7, %v4511_v40  ;;  %v1783_v14 = vpop.f32.mrb[59].mxu1 }
 0x444   : > { %v2043_v15 = vmax.f32 %v1780_v6, 0.0  ;;  %v1784_v62 = vadd.f32 %v1783_v14, %v4514_v44 }
 0x445   : > { %v3011_v16 = vpack.c.bf16 %v2034_v61, %v2034_v61  ;;  %v2039_v17 = vmax.f32 %v1918_v9, 0.0  ;;  %v2047_v18 = vmax.f32 %v1782_v12, 0.0 }
 0x446   : > { %v3016_v19 = vpack.c.bf16 %v2043_v15, %v2042_v11  ;;  %v2048_v59 = vmax.f32 %v1784_v62, 0.0 }
 0x447   : > { %2534 = vst [vmem:[%s4142_s30 + $0x128] sm:$0xf] %v3011_v16  ;;  %v3014_v20 = vpack.c.bf16 %v2039_v17, %v2039_v17 }
 0x448   : > { %2539 = vst [vmem:[%s4142_s30 + $0x148] sm:$0xff] %v3016_v19  ;;  %v3019_v21 = vpack.c.bf16 %v2048_v59, %v2047_v18  ;;  %v1922_v22 = vpop.f32.mrb[60].mxu0  ;;  %v1787_v23 = vpop.f32.mrb[60].mxu1 }
 0x449   : > { %2537 = vst [vmem:[%s4142_s30 + $0x13c] sm:$0xf] %v3014_v20  ;;  %v1923_v1 = vadd.f32 %v1922_v22, %v4529_v8  ;;  %v3345_v24 = vpop.f32.mrb[61].mxu0  ;;  %v1788_v25 = vadd.f32 %v1787_v23, %v4511_v40  ;;  %v1789_v26 = vpop.f32.mrb[61].mxu1 }
 0x44a   : > { %2542 = vst [vmem:[%s4142_s30 + $0x15c] sm:$0xff] %v3019_v21  ;;  %v1925_v27 = vpop.f32.mrb[62].mxu0  ;;  %v1790_v28 = vadd.f32 %v1789_v26, %v4514_v44  ;;  %v1791_v29 = vpop.f32.mrb[62].mxu1 }
 0x44b   : > { %v2044_v30 = vmax.f32 %v1923_v1, 0.0  ;;  %v1926_v31 = vadd.f32 %v1925_v27, %v4529_v8  ;;  %v3346_v32 = vpop.f32.mrb[63].mxu0  ;;  %v2052_v33 = vmax.f32 %v1788_v25, 0.0  ;;  %v1792_v34 = vadd.f32 %v1791_v29, %v4511_v40  ;;  %v1793_v35 = vpop.f32.mrb[63].mxu1 }
 0x44c   : > { %v2053_v36 = vmax.f32 %v1790_v28, 0.0  ;;  %v1794_v37 = vadd.f32 %v1793_v35, %v4514_v44 }
 0x44d   : > { %v3017_v38 = vpack.c.bf16 %v2044_v30, %v2044_v30  ;;  %v2049_v39 = vmax.f32 %v1926_v31, 0.0  ;;  %v2057_v41 = vmax.f32 %v1792_v34, 0.0 }
 0x44e   : > { %v3022_v42 = vpack.c.bf16 %v2053_v36, %v2052_v33  ;;  %v2058_v43 = vmax.f32 %v1794_v37, 0.0 }
 0x44f   : > { %2540 = vst [vmem:[%s4142_s30 + $0x150] sm:$0xf] %v3017_v38  ;;  %v3020_v45 = vpack.c.bf16 %v2049_v39, %v2049_v39 }
 0x450   : > { %2545 = vst [vmem:[%s4142_s30 + $0x170] sm:$0xff] %v3022_v42  ;;  %v3025_v46 = vpack.c.bf16 %v2058_v43, %v2057_v41  ;;  %v1930_v47 = vpop.f32.mrb[64].mxu0  ;;  %v1797_v48 = vpop.f32.mrb[64].mxu1 }
 0x451   : > { %2543 = vst [vmem:[%s4142_s30 + $0x164] sm:$0xf] %v3020_v45  ;;  %v1931_v49 = vadd.f32 %v1930_v47, %v4529_v8  ;;  %v3349_v50 = vpop.f32.mrb[65].mxu0  ;;  %v1798_v51 = vadd.f32 %v1797_v48, %v4511_v40  ;;  %v1799_v52 = vpop.f32.mrb[65].mxu1 }
 0x452   : > { %2548 = vst [vmem:[%s4142_s30 + $0x184] sm:$0xff] %v3025_v46  ;;  %v1933_v53 = vpop.f32.mrb[66].mxu0  ;;  %v1800_v54 = vadd.f32 %v1799_v52, %v4514_v44  ;;  %v1801_v55 = vpop.f32.mrb[66].mxu1 }
 0x453   : > { %v2054_v56 = vmax.f32 %v1931_v49, 0.0  ;;  %v1934_v58 = vadd.f32 %v1933_v53, %v4529_v8  ;;  %v3350_v60 = vpop.f32.mrb[67].mxu0  ;;  %v2062_v63 = vmax.f32 %v1798_v51, 0.0  ;;  %v1802_v0 = vadd.f32 %v1801_v55, %v4511_v40  ;;  %v1803_v2 = vpop.f32.mrb[67].mxu1 }
 0x454   : > { %v2063_v3 = vmax.f32 %v1800_v54, 0.0  ;;  %v1804_v4 = vadd.f32 %v1803_v2, %v4514_v44 }
 0x455   : > { %v3023_v57 = vpack.c.bf16 %v2054_v56, %v2054_v56  ;;  %v2059_v13 = vmax.f32 %v1934_v58, 0.0  ;;  %v2067_v5 = vmax.f32 %v1802_v0, 0.0 }
 0x456   : > { %v3028_v6 = vpack.c.bf16 %v2063_v3, %v2062_v63  ;;  %v2068_v7 = vmax.f32 %v1804_v4, 0.0 }
 0x457   : > { %2546 = vst [vmem:[%s4142_s30 + $0x178] sm:$0xf] %v3023_v57  ;;  %v3026_v61 = vpack.c.bf16 %v2059_v13, %v2059_v13 }
 0x458   : > { %2551 = vst [vmem:[%s4142_s30 + $0x198] sm:$0xff] %v3028_v6  ;;  %v3031_v9 = vpack.c.bf16 %v2068_v7, %v2067_v5  ;;  %v1938_v10 = vpop.f32.mrb[68].mxu0  ;;  %v1807_v11 = vpop.f32.mrb[68].mxu1 }
 0x459   : > { %2549 = vst [vmem:[%s4142_s30 + $0x18c] sm:$0xf] %v3026_v61  ;;  %v1939_v12 = vadd.f32 %v1938_v10, %v4529_v8  ;;  %v3353_v14 = vpop.f32.mrb[69].mxu0  ;;  %v1808_v15 = vadd.f32 %v1807_v11, %v4511_v40  ;;  %v1809_v62 = vpop.f32.mrb[69].mxu1 }
 0x45a   : > { %2554 = vst [vmem:[%s4142_s30 + $0x1ac] sm:$0xff] %v3031_v9  ;;  %v1941_v16 = vpop.f32.mrb[70].mxu0  ;;  %v1810_v17 = vadd.f32 %v1809_v62, %v4514_v44  ;;  %v1811_v18 = vpop.f32.mrb[70].mxu1 }
 0x45b   : > { %v2064_v19 = vmax.f32 %v1939_v12, 0.0  ;;  %v1942_v59 = vadd.f32 %v1941_v16, %v4529_v8  ;;  %v3354_v20 = vpop.f32.mrb[71].mxu0  ;;  %v2072_v21 = vmax.f32 %v1808_v15, 0.0  ;;  %v1812_v22 = vadd.f32 %v1811_v18, %v4511_v40  ;;  %v1813_v23 = vpop.f32.mrb[71].mxu1 }
 0x45c   : > { %v2073_v1 = vmax.f32 %v1810_v17, 0.0  ;;  %v1814_v24 = vadd.f32 %v1813_v23, %v4514_v44 }
 0x45d   : > { %v3029_v25 = vpack.c.bf16 %v2064_v19, %v2064_v19  ;;  %v2069_v26 = vmax.f32 %v1942_v59, 0.0  ;;  %v2077_v27 = vmax.f32 %v1812_v22, 0.0 }
 0x45e   : > { %v3034_v28 = vpack.c.bf16 %v2073_v1, %v2072_v21  ;;  %v2078_v29 = vmax.f32 %v1814_v24, 0.0 }
 0x45f   : > { %2552 = vst [vmem:[%s4142_s30 + $0x1a0] sm:$0xf] %v3029_v25  ;;  %v3032_v30 = vpack.c.bf16 %v2069_v26, %v2069_v26 }
 0x460   : > { %2557 = vst [vmem:[%s4142_s30 + $0x1c0] sm:$0xff] %v3034_v28  ;;  %v3037_v31 = vpack.c.bf16 %v2078_v29, %v2077_v27  ;;  %v1946_v32 = vpop.f32.mrb[72].mxu0  ;;  %v1817_v33 = vpop.f32.mrb[72].mxu1 }
 0x461   : > { %2555 = vst [vmem:[%s4142_s30 + $0x1b4] sm:$0xf] %v3032_v30  ;;  %v1947_v34 = vadd.f32 %v1946_v32, %v4529_v8  ;;  %v3357_v35 = vpop.f32.mrb[73].mxu0  ;;  %v1818_v36 = vadd.f32 %v1817_v33, %v4511_v40  ;;  %v1819_v37 = vpop.f32.mrb[73].mxu1 }
 0x462   : > { %2560 = vst [vmem:[%s4142_s30 + $0x1d4] sm:$0xff] %v3037_v31  ;;  %v1949_v38 = vpop.f32.mrb[74].mxu0  ;;  %v1820_v39 = vadd.f32 %v1819_v37, %v4514_v44  ;;  %v1821_v41 = vpop.f32.mrb[74].mxu1 }
 0x463   : > { %v2074_v42 = vmax.f32 %v1947_v34, 0.0  ;;  %v1950_v43 = vadd.f32 %v1949_v38, %v4529_v8  ;;  %v3358_v45 = vpop.f32.mrb[75].mxu0  ;;  %v2082_v46 = vmax.f32 %v1818_v36, 0.0  ;;  %v1822_v47 = vpop.f32.mrb[75].mxu1 }
 0x464   : > { %v2083_v48 = vmax.f32 %v1820_v39, 0.0 }
 0x465   : > { %v3035_v49 = vpack.c.bf16 %v2074_v42, %v2074_v42  ;;  %v2079_v50 = vmax.f32 %v1950_v43, 0.0 }
 0x466   : > { %v3040_v40 = vpack.c.bf16 %v2083_v48, %v2082_v46 }
 0x467   : > { %2558 = vst [vmem:[%s4142_s30 + $0x1c8] sm:$0xf] %v3035_v49  ;;  %v3038_v51 = vpack.c.bf16 %v2079_v50, %v2079_v50 }
 0x468   : > { %2563 = vst [vmem:[%s4142_s30 + $0x1e8] sm:$0xff] %v3040_v40  ;;  %v1954_v44 = vpop.f32.mrb[76].mxu0 }
 0x469   : > { %2561 = vst [vmem:[%s4142_s30 + $0x1dc] sm:$0xf] %v3038_v51  ;;  %v1955_v52 = vadd.f32 %v1954_v44, %v4529_v8  ;;  %v3361_v53 = vpop.f32.mrb[77].mxu0 }
 0x46a   : > { %v1957_v54 = vpop.f32.mrb[78].mxu0 }
 0x46b   : > { %v2084_v55 = vmax.f32 %v1955_v52, 0.0  ;;  %v3362_v56 = vpop.f32.mrb[79].mxu0 }
 0x46d   : > { %v3041_v58 = vpack.c.bf16 %v2084_v55, %v2084_v55 }
 0x46f   : > { %2564 = vst [vmem:[%s4142_s30 + $0x1f0] sm:$0xf] %v3041_v58 }
 0x470   : > { %3760 = shalt.err (!%p3757_p13)
}
 0x471   : > { %s3761_s30 = scalar_lea.hbm %s4658_s10, 8000  ;;  %s3765_s13 = scalar_lea.hbm %s4775_s14, 40000 }
 0x472   : > { %p3762_p3 = scmp.ne.s32.totalorder %s4658_s10, %s3761_s30  ;;  %p3766_p2 = scmp.lt.u32.totalorder %s4658_s10, %s4775_s14 }
 0x473   : > { %p3767_p12 = scmp.lt.u32.totalorder %s3765_s13, %s3761_s30  ;;  %p3769_p5 = scmp.lt.u32.totalorder %s3761_s30, %s4658_s10 }
 0x474   : > { %p3763_p7 = pnand %p3762_p3, %p4776_p11 }
 0x475   : > { %p3768_p6 = por %p3767_p12, %p3766_p2 }
 0x476   : > { %p3764_p8 = pneg %p3763_p7 }
 0x477   : > { %p3770_p10 = por %p3769_p5, %p3768_p6 }
 0x479   : > { %p3771_p9 = pnand %p3770_p10, %p3764_p8 }
 0x47b   : > { %3774 = shalt.err (!%p3771_p9)
}
 0x47c   : > { %s3855_s9 = smov 320   ;;  %s3856_s18 = smov 1600  }
 0x47d   : > { %s3857_s29 = smov 20  }
 0x47e   : > { %3416 = dma.vmem_to_hbm [thread:$0]  (%p4776_p11), %s4660_s11, 8000, %s4658_s10, %s2566_s2, %s3855_s9, %s3856_s18, %s3857_s29  }
 0x47f PF: > { %s4777_s19 = sld [smem:[#allocation17_spill]]  ;;  %s4778_s24 = sld [smem:[#allocation20_spill]] }
 0x480   : > { %p3446_p4 = scmp.ge.s32.totalorder %s3837_s26, 2 }
 0x485   : > { %s2597_s12 = sand.u32 1, %s4777_s19   ;;  %p4779_p0 = scmp.ne.s32.totalorder %s4778_s24, 0 }
 0x486   : > { %s2598_s4 = scalar_lea.sflag [#allocation5], %s2597_s12 }
 0x487   : > { %p3436_p1 = pnand %p3446_p4, %p4779_p0 }
 0x489   : > { %3812 = dma.done.wait (!%p3436_p1), %s2598_s4, 8000  }
 0x48a   : > { %3814 = vsyncadd (!%p3436_p1), %s2598_s4, 4294959296  ;;  %s24_s26 = sadd.s32 1, %s3837_s26   ;;  %s4780_s20 = sld [smem:[#allocation21_spill]] }
 0x48b   : > { %p21_p13 = scmp.ge.s32.totalorder %s24_s26, 7   ;;  %s4781_s21 = smov %s3821_s22 }
 0x48c   : > { %s4782_s22 = smov %s3825_s23  ;;  %s4783_s23 = smov %s4020_s8 }
 0x48d   : > { %s4784_s24 = smov %s3833_s25  ;;  %23 = sbr.rel (!%p21_p13) target bundleno = 13 (0xd), region = 120 }
 0x490   : > { %s4785_s25 = smov %s4780_s20 }
 0x494   :  { %2603 = vsyncpa [#allocation4], 1 }
 0x495   :  { %2605 = vsyncpa [#allocation4 + $0x1], 1 }
 0x496   :  { %2606 = vsyncpa [#allocation7], 1 }
 0x497   :  { %2607 = vsyncpa [#allocation10], 1 }
 0x498   :  { %2609 = vsyncpa [#allocation10 + $0x1], 1 }
 0x499   :  { %2610 = vsyncpa [#allocation5], 1 }
 0x49a   :  { %2612 = vsyncpa [#allocation5 + $0x1], 1 }

</bundles_post_ra>
